<compile_context>
chip_gen: v6e
topology: v6e:2x2x1
jax: 0.10.0
libtpu: 0.0.40
codegen_flags: <defaults>
</compile_context>

<pallas_src>
import math
from typing import NamedTuple

import jax
import jax.numpy as jnp
from jax import lax
from jax.experimental import pallas as pl
from jax.experimental.pallas import tpu as pltpu

# ----------------------------- model dimensions ------------------------------
D_CURVE_EMB = 16   # FeatureExtractor output_dim_curves (QuickTune default)
D_META_EMB = 8     # output_dim_metafeatures
D_FE_OUT = 1       # output_dim_feature_extractor
_HP = jax.lax.Precision.HIGHEST   # host-side (one-time) matrixisation only


def _leaky_relu(x, slope=0.01):
    return jnp.where(x > 0, x, slope * x)


def _round_up(x, m):
    return (x + m - 1) // m * m


# --------------------------- host-side matrixisation --------------------------
def _conv_same_matrix(w_torch, length):
    """Conv1d(kernel=3, stride=1, padding=same) with weight (C_out, C_in, 3)
    as a dense (length*C_in, length*C_out) matrix acting on row-major
    (length, C_in) flattened activations."""
    c_out, c_in, _ = w_torch.shape
    wio = jnp.transpose(w_torch, (2, 1, 0)).astype(jnp.float32)        # (3, C_in, C_out)
    basis = jnp.eye(length * c_in, dtype=jnp.float32).reshape(length * c_in, length, c_in)
    y = lax.conv_general_dilated(basis, wio, (1,), "SAME",
                                 dimension_numbers=("NWC", "WIO", "NWC"),
                                 precision=_HP)
    return y.reshape(length * c_in, length * c_out)


def _fold_pool(m, length, c):
    """Fold MaxPool1d(2) into a matrix whose columns are row-major (length, c):
    reorder columns to [even positions | odd positions].  The kernel then takes
    max of the two lane-aligned halves.  Exact (pure column permutation)."""
    rows = m.shape[0]
    m3 = m.reshape(rows, length, c)
    even = m3[:, 0::2, :].reshape(rows, (length // 2) * c)
    odd = m3[:, 1::2, :].reshape(rows, (length // 2) * c)
    return jnp.concatenate([even, odd], axis=1)


class _Packer:
    """Packs many small 2-D parameter blocks into one lane-dense f32 buffer.
    Row offsets stay multiples of 8 so the kernel carves blocks back out with
    static, sublane-aligned ref slices (zero-cost views)."""

    def __init__(self, width):
        self.width = width
        self.rows = 0
        self._blocks = []
        self.off = {}

    def add(self, name, arr):
        arr = jnp.asarray(arr, jnp.float32)
        if arr.ndim == 1:
            arr = arr.reshape(1, -1)
        assert arr.ndim == 2 and arr.shape[1] <= self.width, (name, arr.shape)
        self.off[name] = self.rows
        self._blocks.append((self.rows, arr))
        self.rows += _round_up(arr.shape[0], 8)

    def finalize(self):
        buf = jnp.zeros((max(self.rows, 8), self.width), jnp.float32)
        for r0, arr in self._blocks:
            buf = buf.at[r0:r0 + arr.shape[0], :arr.shape[1]].set(arr)
        return buf


def _pack_params(p, d_hps, d_meta, L, H):
    L2, L4, L8 = L // 2, L // 4, L // 8
    d_xhb = _round_up(d_hps + 1, 8)

    # ---- wide buffer: matrixised curve embedder, pool FOLDED in (width 8L) ----
    # TODO(synk): for L >= ~192 these dense banded conv matrices grow O(L^2) and
    # start to threaten v7x's 64 MiB VMEM; switch to a tap-wise pltpu.roll
    # formulation for much longer learning curves.
    wp = _Packer(8 * L)
    wp.add("M1", _fold_pool(_conv_same_matrix(p["conv1_w"], L), L, 8))     # (L,  8L)
    wp.add("M2", _fold_pool(_conv_same_matrix(p["conv2_w"], L2), L2, 16))  # (4L, 8L)
    wp.add("M3", _fold_pool(_conv_same_matrix(p["conv3_w"], L4), L4, 32))  # (4L, 8L)
    wp.add("CB", jnp.stack([                                               # per-position conv biases (folded)
        _fold_pool(jnp.tile(p["conv1_b"], L).reshape(1, -1), L, 8)[0],
        _fold_pool(jnp.tile(p["conv2_b"], L2).reshape(1, -1), L2, 16)[0],
        _fold_pool(jnp.tile(p["conv3_b"], L4).reshape(1, -1), L4, 32)[0]]))  # (3, 8L)

    # ---- narrow buffer: MLP weights + all biases (width = 128 lanes) ----
    nq = _Packer(128)
    # AdaptiveAvgPool1d(1) (mean over L8) folded into the curve fc weight.
    nq.add("MAVG", jnp.tile(p["curve_fc_w"].T, (L8, 1)) / L8)   # (L8*32, 16)
    nq.add("WM", p["meta_fc_w"].T)                               # (d_meta, 8)
    w1t = jnp.asarray(p["fc1_w"].T, jnp.float32)                 # (F, H); F = d_hps+1+16+8
    w1hb = jnp.zeros((d_xhb, H), jnp.float32).at[:d_hps + 1, :].set(w1t[:d_hps + 1])
    nq.add("W1HB", w1hb)                                         # [hps | budget | 0-pad] block
    nq.add("W1C", w1t[d_hps + 1:d_hps + 1 + D_CURVE_EMB])
    nq.add("W1M", w1t[d_hps + 1 + D_CURVE_EMB:d_hps + 1 + D_CURVE_EMB + D_META_EMB])
    nq.add("W2", p["fc2_w"].T)
    nq.add("W3", p["fc3_w"].T)
    bias = jnp.zeros((8, 128), jnp.float32)
    bias = bias.at[0, :D_CURVE_EMB].set(p["curve_fc_b"])
    bias = bias.at[1, :D_META_EMB].set(p["meta_fc_b"])
    bias = bias.at[2, :H].set(p["fc1_b"])
    bias = bias.at[3, :H].set(p["fc2_b"])
    bias = bias.at[4, 0].set(p["fc3_b"][0])
    bias = bias.at[5, 0].set(p["cp_fc1_w"][0, 0])
    bias = bias.at[6, 0].set(p["cp_fc1_b"][0])
    nq.add("BIAS", bias)

    return wp.finalize(), nq.finalize(), wp.off, nq.off


class PackedCostPredictor(NamedTuple):
    wide: jax.Array
    narrow: jax.Array
    off_w: dict
    off_n: dict
    d_hps: int
    d_meta: int
    L: int
    H: int


def pack_cost_predictor_params(params, d_hps, d_meta, L, H):
    """One-time, host-side weight packing.  Call once per parameter set and keep
    the result device-resident (this dominates the per-call cost at small B)."""
    # TODO(synk): the matrixised curve embedder assumes L % 32 == 0 (three even
    # pools + lane-aligned [even|odd] split); odd-length floor pooling unsupported.
    assert L % 32 == 0 and H <= 128, (L, H)
    wide, narrow, ow, on = _pack_params(params, d_hps, d_meta, L, H)
    return PackedCostPredictor(jax.device_put(wide), jax.device_put(narrow),
                               ow, on, d_hps, d_meta, L, H)


# ------------------------------ the Pallas kernel -----------------------------
def _make_kernel(d_xhb, d_meta, L, H, ow, on):
    f32 = jnp.float32
    L2, L4, L8 = L // 2, L // 4, L // 8
    WC = 8 * L            # flattened (length*channels) width of every conv layer
    HALF = WC // 2        # lane-aligned [even|odd] split point (multiple of 128)

    def dot(a, b):
        # Default MXU precision: single bf16 pass, f32 accumulation.
        return jnp.dot(a, b, preferred_element_type=f32)

    def kernel(xhb_ref, curves_ref, meta_ref, w_ref, n_ref, out_ref):
        cb0 = ow["CB"]

        # Conv1d(k=3,same)+bias+ReLU with MaxPool1d(2) pre-folded into the
        # banded matrix: ONE MXU matmul + max of the two lane-aligned halves.
        def conv_relu_pool(x, m_name, m_rows, bias_row):
            h = dot(x, w_ref[ow[m_name]:ow[m_name] + m_rows, :])
            h = h + w_ref[cb0 + bias_row:cb0 + bias_row + 1, :]
            h = jnp.maximum(h, 0.0)
            return jnp.maximum(h[:, :HALF], h[:, HALF:])

        x = curves_ref[...]                                    # (TB, L)
        x = conv_relu_pool(x, "M1", L,       0)                # (TB, L2*8)
        x = conv_relu_pool(x, "M2", L2 * 8,  1)                # (TB, L4*16)
        x = conv_relu_pool(x, "M3", L4 * 16, 2)                # (TB, L8*32)

        # AdaptiveAvgPool1d(1) + Linear(32 -> 16), folded into one matrix.
        curves_emb = (dot(x, n_ref[on["MAVG"]:on["MAVG"] + L8 * 32, 0:D_CURVE_EMB])
                      + n_ref[on["BIAS"]:on["BIAS"] + 1, 0:D_CURVE_EMB])       # (TB, 16)

        # ---------------- metafeature embedding ----------------
        meta_emb = (dot(meta_ref[...], n_ref[on["WM"]:on["WM"] + d_meta, 0:D_META_EMB])
                    + n_ref[on["BIAS"] + 1:on["BIAS"] + 2, 0:D_META_EMB])      # (TB, 8)

        # ---------------- FeatureExtractor MLP ----------------
        # fc1 over cat([hps, budget, curves_emb, meta_emb]) via column-blocked weights.
        h = (dot(xhb_ref[...], n_ref[on["W1HB"]:on["W1HB"] + d_xhb, 0:H])
             + dot(curves_emb, n_ref[on["W1C"]:on["W1C"] + D_CURVE_EMB, 0:H])
             + dot(meta_emb, n_ref[on["W1M"]:on["W1M"] + D_META_EMB, 0:H])
             + n_ref[on["BIAS"] + 2:on["BIAS"] + 3, 0:H])
        h = _leaky_relu(h)
        h = _leaky_relu(dot(h, n_ref[on["W2"]:on["W2"] + H, 0:H])
                        + n_ref[on["BIAS"] + 3:on["BIAS"] + 4, 0:H])
        fe = (dot(h, n_ref[on["W3"]:on["W3"] + H, 0:1])
              + n_ref[on["BIAS"] + 4:on["BIAS"] + 5, 0:1])                     # (TB, 1)

        # ---------------- CostPredictor head: ReLU -> Linear(1,1) -> ReLU ----
        r = jnp.maximum(fe, 0.0)
        out = jnp.maximum(r * n_ref[on["BIAS"] + 5:on["BIAS"] + 6, 0:1]
                          + n_ref[on["BIAS"] + 6:on["BIAS"] + 7, 0:1], 0.0)
        out_ref[...] = out.astype(out_ref.dtype)

    return kernel


# ------------------------------ parameter handling ----------------------------
def init_params(key, d_hps, d_meta, hidden):
    """Deterministic PyTorch-default-style init (uniform +/- 1/sqrt(fan_in))."""
    keys = jax.random.split(key, 9)

    def lin(k, fan_in, fan_out):
        kw, kb = jax.random.split(k)
        bound = 1.0 / math.sqrt(fan_in)
        w = jax.random.uniform(kw, (fan_out, fan_in), jnp.float32, -bound, bound)
        b = jax.random.uniform(kb, (fan_out,), jnp.float32, -bound, bound)
        return w, b

    def conv(k, c_in, c_out, ks=3):
        kw, kb = jax.random.split(k)
        bound = 1.0 / math.sqrt(c_in * ks)
        w = jax.random.uniform(kw, (c_out, c_in, ks), jnp.float32, -bound, bound)
        b = jax.random.uniform(kb, (c_out,), jnp.float32, -bound, bound)
        return w, b

    p = {}
    p["conv1_w"], p["conv1_b"] = conv(keys[0], 1, 8)
    p["conv2_w"], p["conv2_b"] = conv(keys[1], 8, 16)
    p["conv3_w"], p["conv3_b"] = conv(keys[2], 16, 32)
    p["curve_fc_w"], p["curve_fc_b"] = lin(keys[3], 32, D_CURVE_EMB)
    p["meta_fc_w"], p["meta_fc_b"] = lin(keys[4], d_meta, D_META_EMB)
    F = d_hps + 1 + D_CURVE_EMB + D_META_EMB
    p["fc1_w"], p["fc1_b"] = lin(keys[5], F, hidden)
    p["fc2_w"], p["fc2_b"] = lin(keys[6], hidden, hidden)
    p["fc3_w"], p["fc3_b"] = lin(keys[7], hidden, D_FE_OUT)
    p["cp_fc1_w"], p["cp_fc1_b"] = lin(keys[8], D_FE_OUT, 1)
    return p


# ---------------------------------- wrapper -----------------------------------
def cost_predictor_forward(packed, hps, budgets, curves, metafeatures):
    """Forward pass with pre-packed weights (pack_cost_predictor_params)."""
    # TODO(synk): the metafeatures=None branch of the original FeatureExtractor
    # is not implemented; this kernel always consumes metafeatures.
    f32 = jnp.float32
    B, d_hps = hps.shape
    L = curves.shape[1]
    d_meta = metafeatures.shape[1]
    assert (d_hps, d_meta, L) == (packed.d_hps, packed.d_meta, packed.L)
    H = packed.H
    d_xhb = _round_up(d_hps + 1, 8)

    # [hps | budget | 0-pad] padded to a sublane multiple (e.g. 17 -> 24).
    xhb = jnp.zeros((B, d_xhb), f32)
    xhb = xhb.at[:, :d_hps].set(hps.astype(f32))
    xhb = xhb.at[:, d_hps].set(budgets.astype(f32).reshape(B))
    curves = curves.astype(f32)
    meta = metafeatures.astype(f32)

    # Batch tile policy: one grid step for small B (single-TC v5e/v6e friendly,
    # no per-step overhead); >=2 "parallel" steps for larger B so v7x's two
    # TensorCores both run; capped at 1024 rows/step to bound per-step VMEM.
    if B <= 128:
        tile_b = _round_up(B, 8)
    else:
        tile_b = min(1024, _round_up(-(-B // 2), 8))
    bp = _round_up(B, tile_b)
    if bp != B:
        pad = lambda a: jnp.concatenate(
            [a, jnp.zeros((bp - B,) + a.shape[1:], a.dtype)], axis=0)
        xhb, curves, meta = pad(xhb), pad(curves), pad(meta)

    kernel = _make_kernel(d_xhb, d_meta, L, H, packed.off_w, packed.off_n)
    wide, narrow = packed.wide, packed.narrow

    out = pl.pallas_call(
        kernel,
        out_shape=jax.ShapeDtypeStruct((bp, 1), f32),
        grid=(bp // tile_b,),
        in_specs=[
            pl.BlockSpec((tile_b, d_xhb), lambda i: (i, 0)),
            pl.BlockSpec((tile_b, L), lambda i: (i, 0)),
            pl.BlockSpec((tile_b, d_meta), lambda i: (i, 0)),
            # Packed weight buffers: constant index_map -> DMA'd once, stay resident.
            pl.BlockSpec(wide.shape, lambda i: (0, 0)),
            pl.BlockSpec(narrow.shape, lambda i: (0, 0)),
        ],
        out_specs=pl.BlockSpec((tile_b, 1), lambda i: (i, 0)),
        compiler_params=pltpu.CompilerParams(
            dimension_semantics=("parallel",),
            vmem_limit_bytes=32 * 1024 * 1024),
    )(xhb, curves, meta, wide, narrow)
    # TODO(synk): for very large B a lane-dense output slab (lane dim padded to
    # 128) would avoid masked (B, 1) column stores; kept (B, 1) to match the API.
    return out[:B]


# --------------------------- pure-JAX reference (check) -----------------------
def reference_forward(p, hps, budgets, curves, metafeatures):
    dot = lambda a, b: jnp.dot(a, b, precision=_HP)   # full-f32 reference
    B = hps.shape[0]
    bud = budgets.reshape(B, 1)
    x = curves[:, :, None]                                    # NWC, C=1
    for i in (1, 2, 3):
        w = jnp.transpose(p[f"conv{i}_w"], (2, 1, 0))         # WIO
        x = lax.conv_general_dilated(x, w, (1,), "SAME",
                                     dimension_numbers=("NWC", "WIO", "NWC"),
                                     precision=_HP)
        x = jnp.maximum(x + p[f"conv{i}_b"][None, None, :], 0.0)
        L2 = x.shape[1] // 2
        x = jnp.maximum(x[:, 0:2 * L2:2, :], x[:, 1:2 * L2:2, :])
    pooled = jnp.mean(x, axis=1)
    curves_emb = dot(pooled, p["curve_fc_w"].T) + p["curve_fc_b"]
    meta_emb = dot(metafeatures, p["meta_fc_w"].T) + p["meta_fc_b"]
    feat = jnp.concatenate([hps, bud, curves_emb, meta_emb], axis=1)
    h = _leaky_relu(dot(feat, p["fc1_w"].T) + p["fc1_b"])
    h = _leaky_relu(dot(h, p["fc2_w"].T) + p["fc2_b"])
    fe = dot(h, p["fc3_w"].T) + p["fc3_b"]
    r = jnp.maximum(fe, 0.0)
    return jnp.maximum(dot(r, p["cp_fc1_w"].T) + p["cp_fc1_b"], 0.0)


# ------------------------------------ main -------------------------------------
if __name__ == "__main__":
    B, D_HPS, L, D_META, HIDDEN = 8, 16, 64, 32, 32

    key = jax.random.PRNGKey(0)
    k1, k2, k3, k4, kp = jax.random.split(key, 5)
    hps = jax.random.uniform(k1, (B, D_HPS), jnp.float32)
    budgets = jax.random.uniform(k2, (B,), jnp.float32)
    curves = jax.random.uniform(k3, (B, L), jnp.float32)
    metafeatures = jax.random.uniform(k4, (B, D_META), jnp.float32)

    params = init_params(kp, D_HPS, D_META, HIDDEN)
    packed = pack_cost_predictor_params(params, D_HPS, D_META, L, HIDDEN)  # pack ONCE

    out = cost_predictor_forward(packed, hps, budgets, curves, metafeatures)
    out = jax.block_until_ready(out)

    ref = reference_forward(params, hps, budgets, curves, metafeatures)
    assert out.shape == (B, 1), out.shape
    # Tolerance reflects the deliberate precision change: the kernel's dots run
    # at default MXU precision (single bf16 pass, f32 accumulate) while the
    # reference is full f32; expected deviation is O(1e-3).
    if not jnp.allclose(out, ref, atol=2e-2, rtol=2e-2):
        raise AssertionError(
            f"mismatch (max abs diff {jnp.max(jnp.abs(out - ref))}): "
            f"kernel={out.ravel()} ref={ref.ravel()}")
    print("KERNEL_OK")
</pallas_src>

<mosaic_0001>
module attributes {stable_mosaic.version = 11 : i64} {
  func.func @kernel(%arg0: i32, %arg1: memref<8x24xf32, #tpu.memory_space<vmem>>, %arg2: memref<8x64xf32, #tpu.memory_space<vmem>>, %arg3: memref<8x32xf32, #tpu.memory_space<vmem>>, %arg4: memref<584x512xf32, #tpu.memory_space<vmem>>, %arg5: memref<408x128xf32, #tpu.memory_space<vmem>>, %arg6: memref<8x1xf32, #tpu.memory_space<vmem>>) attributes {dimension_semantics = [#tpu.dimension_semantics<parallel>], iteration_bounds = array<i64: 1>, scalar_prefetch = 0 : i64, scratch_operands = 0 : i64, tpu.core_type = #tpu.core_type<tc>, window_params = [{transform_indices = @transform_0, window_bounds = array<i64: 8, 24>}, {transform_indices = @transform_1, window_bounds = array<i64: 8, 64>}, {transform_indices = @transform_2, window_bounds = array<i64: 8, 32>}, {pipeline_mode = #tpu.pipeline_mode<synchronous>, transform_indices = @transform_3, window_bounds = array<i64: 584, 512>}, {pipeline_mode = #tpu.pipeline_mode<synchronous>, transform_indices = @transform_4, window_bounds = array<i64: 408, 128>}, {transform_indices = @transform_5, window_bounds = array<i64: 8, 1>}]} {
    %c0 = arith.constant 0 : index
    %c0_0 = arith.constant 0 : index
    %0 = vector.load %arg2[%c0, %c0_0] : memref<8x64xf32, #tpu.memory_space<vmem>>, vector<8x64xf32>
    %c0_1 = arith.constant 0 : index
    %c0_2 = arith.constant 0 : index
    %1 = vector.load %arg4[%c0_1, %c0_2] : memref<584x512xf32, #tpu.memory_space<vmem>>, vector<64x512xf32>
    %cst = arith.constant dense<0.000000e+00> : vector<8x512xf32>
    %2 = tpu.matmul %0, %1, %cst {dimension_numbers = #tpu.dot_dimension_numbers<[1], [0], [0], [1], [0, 0, 1, 1], [], []>} : vector<8x64xf32>, vector<64x512xf32>, vector<8x512xf32> -> vector<8x512xf32>
    %c576 = arith.constant 576 : index
    %c0_3 = arith.constant 0 : index
    %3 = vector.load %arg4[%c576, %c0_3] : memref<584x512xf32, #tpu.memory_space<vmem>>, vector<1x512xf32>
    %4 = vector.broadcast %3 : vector<1x512xf32> to vector<8x512xf32>
    %5 = arith.addf %2, %4 : vector<8x512xf32>
    %cst_4 = arith.constant 0.000000e+00 : f32
    %6 = vector.broadcast %cst_4 : f32 to vector<8x512xf32>
    %7 = arith.maximumf %5, %6 : vector<8x512xf32>
    %8 = vector.extract_strided_slice %7 {offsets = [0, 0], sizes = [8, 256], strides = [1, 1]} : vector<8x512xf32> to vector<8x256xf32>
    %9 = vector.extract_strided_slice %7 {offsets = [0, 256], sizes = [8, 256], strides = [1, 1]} : vector<8x512xf32> to vector<8x256xf32>
    %10 = arith.maximumf %8, %9 : vector<8x256xf32>
    %c64 = arith.constant 64 : index
    %c0_5 = arith.constant 0 : index
    %11 = vector.load %arg4[%c64, %c0_5] : memref<584x512xf32, #tpu.memory_space<vmem>>, vector<256x512xf32>
    %cst_6 = arith.constant dense<0.000000e+00> : vector<8x512xf32>
    %12 = tpu.matmul %10, %11, %cst_6 {dimension_numbers = #tpu.dot_dimension_numbers<[1], [0], [0], [1], [0, 0, 1, 1], [], []>} : vector<8x256xf32>, vector<256x512xf32>, vector<8x512xf32> -> vector<8x512xf32>
    %c577 = arith.constant 577 : index
    %c0_7 = arith.constant 0 : index
    %13 = vector.load %arg4[%c577, %c0_7] : memref<584x512xf32, #tpu.memory_space<vmem>>, vector<1x512xf32>
    %14 = vector.broadcast %13 : vector<1x512xf32> to vector<8x512xf32>
    %15 = arith.addf %12, %14 : vector<8x512xf32>
    %cst_8 = arith.constant 0.000000e+00 : f32
    %16 = vector.broadcast %cst_8 : f32 to vector<8x512xf32>
    %17 = arith.maximumf %15, %16 : vector<8x512xf32>
    %18 = vector.extract_strided_slice %17 {offsets = [0, 0], sizes = [8, 256], strides = [1, 1]} : vector<8x512xf32> to vector<8x256xf32>
    %19 = vector.extract_strided_slice %17 {offsets = [0, 256], sizes = [8, 256], strides = [1, 1]} : vector<8x512xf32> to vector<8x256xf32>
    %20 = arith.maximumf %18, %19 : vector<8x256xf32>
    %c320 = arith.constant 320 : index
    %c0_9 = arith.constant 0 : index
    %21 = vector.load %arg4[%c320, %c0_9] : memref<584x512xf32, #tpu.memory_space<vmem>>, vector<256x512xf32>
    %cst_10 = arith.constant dense<0.000000e+00> : vector<8x512xf32>
    %22 = tpu.matmul %20, %21, %cst_10 {dimension_numbers = #tpu.dot_dimension_numbers<[1], [0], [0], [1], [0, 0, 1, 1], [], []>} : vector<8x256xf32>, vector<256x512xf32>, vector<8x512xf32> -> vector<8x512xf32>
    %c578 = arith.constant 578 : index
    %c0_11 = arith.constant 0 : index
    %23 = vector.load %arg4[%c578, %c0_11] : memref<584x512xf32, #tpu.memory_space<vmem>>, vector<1x512xf32>
    %24 = vector.broadcast %23 : vector<1x512xf32> to vector<8x512xf32>
    %25 = arith.addf %22, %24 : vector<8x512xf32>
    %cst_12 = arith.constant 0.000000e+00 : f32
    %26 = vector.broadcast %cst_12 : f32 to vector<8x512xf32>
    %27 = arith.maximumf %25, %26 : vector<8x512xf32>
    %28 = vector.extract_strided_slice %27 {offsets = [0, 0], sizes = [8, 256], strides = [1, 1]} : vector<8x512xf32> to vector<8x256xf32>
    %29 = vector.extract_strided_slice %27 {offsets = [0, 256], sizes = [8, 256], strides = [1, 1]} : vector<8x512xf32> to vector<8x256xf32>
    %30 = arith.maximumf %28, %29 : vector<8x256xf32>
    %c0_13 = arith.constant 0 : index
    %c0_14 = arith.constant 0 : index
    %31 = vector.load %arg5[%c0_13, %c0_14] : memref<408x128xf32, #tpu.memory_space<vmem>>, vector<256x16xf32>
    %cst_15 = arith.constant dense<0.000000e+00> : vector<8x16xf32>
    %32 = tpu.matmul %30, %31, %cst_15 {dimension_numbers = #tpu.dot_dimension_numbers<[1], [0], [0], [1], [0, 0, 1, 1], [], []>} : vector<8x256xf32>, vector<256x16xf32>, vector<8x16xf32> -> vector<8x16xf32>
    %c400 = arith.constant 400 : index
    %c0_16 = arith.constant 0 : index
    %33 = vector.load %arg5[%c400, %c0_16] : memref<408x128xf32, #tpu.memory_space<vmem>>, vector<1x16xf32>
    %34 = vector.broadcast %33 : vector<1x16xf32> to vector<8x16xf32>
    %35 = arith.addf %32, %34 : vector<8x16xf32>
    %c0_17 = arith.constant 0 : index
    %c0_18 = arith.constant 0 : index
    %36 = vector.load %arg3[%c0_17, %c0_18] : memref<8x32xf32, #tpu.memory_space<vmem>>, vector<8x32xf32>
    %c256 = arith.constant 256 : index
    %c0_19 = arith.constant 0 : index
    %37 = vector.load %arg5[%c256, %c0_19] : memref<408x128xf32, #tpu.memory_space<vmem>>, vector<32x8xf32>
    %cst_20 = arith.constant dense<0.000000e+00> : vector<8x8xf32>
    %38 = tpu.matmul %36, %37, %cst_20 {dimension_numbers = #tpu.dot_dimension_numbers<[1], [0], [0], [1], [0, 0, 1, 1], [], []>} : vector<8x32xf32>, vector<32x8xf32>, vector<8x8xf32> -> vector<8x8xf32>
    %c401 = arith.constant 401 : index
    %c0_21 = arith.constant 0 : index
    %39 = vector.load %arg5[%c401, %c0_21] : memref<408x128xf32, #tpu.memory_space<vmem>>, vector<1x8xf32>
    %40 = vector.broadcast %39 : vector<1x8xf32> to vector<8x8xf32>
    %41 = arith.addf %38, %40 : vector<8x8xf32>
    %c0_22 = arith.constant 0 : index
    %c0_23 = arith.constant 0 : index
    %42 = vector.load %arg1[%c0_22, %c0_23] : memref<8x24xf32, #tpu.memory_space<vmem>>, vector<8x24xf32>
    %c288 = arith.constant 288 : index
    %c0_24 = arith.constant 0 : index
    %43 = vector.load %arg5[%c288, %c0_24] : memref<408x128xf32, #tpu.memory_space<vmem>>, vector<24x32xf32>
    %cst_25 = arith.constant dense<0.000000e+00> : vector<8x32xf32>
    %44 = tpu.matmul %42, %43, %cst_25 {dimension_numbers = #tpu.dot_dimension_numbers<[1], [0], [0], [1], [0, 0, 1, 1], [], []>} : vector<8x24xf32>, vector<24x32xf32>, vector<8x32xf32> -> vector<8x32xf32>
    %c312 = arith.constant 312 : index
    %c0_26 = arith.constant 0 : index
    %45 = vector.load %arg5[%c312, %c0_26] : memref<408x128xf32, #tpu.memory_space<vmem>>, vector<16x32xf32>
    %cst_27 = arith.constant dense<0.000000e+00> : vector<8x32xf32>
    %46 = tpu.matmul %35, %45, %cst_27 {dimension_numbers = #tpu.dot_dimension_numbers<[1], [0], [0], [1], [0, 0, 1, 1], [], []>} : vector<8x16xf32>, vector<16x32xf32>, vector<8x32xf32> -> vector<8x32xf32>
    %47 = arith.addf %44, %46 : vector<8x32xf32>
    %c328 = arith.constant 328 : index
    %c0_28 = arith.constant 0 : index
    %48 = vector.load %arg5[%c328, %c0_28] : memref<408x128xf32, #tpu.memory_space<vmem>>, vector<8x32xf32>
    %cst_29 = arith.constant dense<0.000000e+00> : vector<8x32xf32>
    %49 = tpu.matmul %41, %48, %cst_29 {dimension_numbers = #tpu.dot_dimension_numbers<[1], [0], [0], [1], [0, 0, 1, 1], [], []>} : vector<8x8xf32>, vector<8x32xf32>, vector<8x32xf32> -> vector<8x32xf32>
    %50 = arith.addf %47, %49 : vector<8x32xf32>
    %c402 = arith.constant 402 : index
    %c0_30 = arith.constant 0 : index
    %51 = vector.load %arg5[%c402, %c0_30] : memref<408x128xf32, #tpu.memory_space<vmem>>, vector<1x32xf32>
    %52 = vector.broadcast %51 : vector<1x32xf32> to vector<8x32xf32>
    %53 = arith.addf %50, %52 : vector<8x32xf32>
    %cst_31 = arith.constant 0.000000e+00 : f32
    %54 = vector.broadcast %cst_31 : f32 to vector<8x32xf32>
    %55 = arith.cmpf ogt, %53, %54 : vector<8x32xf32>
    %cst_32 = arith.constant 0.00999999977 : f32
    %56 = vector.broadcast %cst_32 : f32 to vector<8x32xf32>
    %57 = arith.mulf %56, %53 : vector<8x32xf32>
    %58 = arith.select %55, %53, %57 : vector<8x32xi1>, vector<8x32xf32>
    %c336 = arith.constant 336 : index
    %c0_33 = arith.constant 0 : index
    %59 = vector.load %arg5[%c336, %c0_33] : memref<408x128xf32, #tpu.memory_space<vmem>>, vector<32x32xf32>
    %cst_34 = arith.constant dense<0.000000e+00> : vector<8x32xf32>
    %60 = tpu.matmul %58, %59, %cst_34 {dimension_numbers = #tpu.dot_dimension_numbers<[1], [0], [0], [1], [0, 0, 1, 1], [], []>} : vector<8x32xf32>, vector<32x32xf32>, vector<8x32xf32> -> vector<8x32xf32>
    %c403 = arith.constant 403 : index
    %c0_35 = arith.constant 0 : index
    %61 = vector.load %arg5[%c403, %c0_35] : memref<408x128xf32, #tpu.memory_space<vmem>>, vector<1x32xf32>
    %62 = vector.broadcast %61 : vector<1x32xf32> to vector<8x32xf32>
    %63 = arith.addf %60, %62 : vector<8x32xf32>
    %cst_36 = arith.constant 0.000000e+00 : f32
    %64 = vector.broadcast %cst_36 : f32 to vector<8x32xf32>
    %65 = arith.cmpf ogt, %63, %64 : vector<8x32xf32>
    %cst_37 = arith.constant 0.00999999977 : f32
    %66 = vector.broadcast %cst_37 : f32 to vector<8x32xf32>
    %67 = arith.mulf %66, %63 : vector<8x32xf32>
    %68 = arith.select %65, %63, %67 : vector<8x32xi1>, vector<8x32xf32>
    %c368 = arith.constant 368 : index
    %c0_38 = arith.constant 0 : index
    %69 = vector.load %arg5[%c368, %c0_38] : memref<408x128xf32, #tpu.memory_space<vmem>>, vector<32x1xf32>
    %cst_39 = arith.constant dense<0.000000e+00> : vector<8x1xf32>
    %70 = tpu.matmul %68, %69, %cst_39 {dimension_numbers = #tpu.dot_dimension_numbers<[1], [0], [0], [1], [0, 0, 1, 1], [], []>} : vector<8x32xf32>, vector<32x1xf32>, vector<8x1xf32> -> vector<8x1xf32>
    %c404 = arith.constant 404 : index
    %c0_40 = arith.constant 0 : index
    %71 = vector.load %arg5[%c404, %c0_40] : memref<408x128xf32, #tpu.memory_space<vmem>>, vector<1x1xf32>
    %72 = vector.broadcast %71 : vector<1x1xf32> to vector<8x1xf32>
    %73 = arith.addf %70, %72 : vector<8x1xf32>
    %cst_41 = arith.constant 0.000000e+00 : f32
    %74 = vector.broadcast %cst_41 : f32 to vector<8x1xf32>
    %75 = arith.maximumf %73, %74 : vector<8x1xf32>
    %c405 = arith.constant 405 : index
    %c0_42 = arith.constant 0 : index
    %76 = vector.load %arg5[%c405, %c0_42] : memref<408x128xf32, #tpu.memory_space<vmem>>, vector<1x1xf32>
    %77 = vector.broadcast %76 : vector<1x1xf32> to vector<8x1xf32>
    %78 = arith.mulf %75, %77 : vector<8x1xf32>
    %c406 = arith.constant 406 : index
    %c0_43 = arith.constant 0 : index
    %79 = vector.load %arg5[%c406, %c0_43] : memref<408x128xf32, #tpu.memory_space<vmem>>, vector<1x1xf32>
    %80 = vector.broadcast %79 : vector<1x1xf32> to vector<8x1xf32>
    %81 = arith.addf %78, %80 : vector<8x1xf32>
    %cst_44 = arith.constant 0.000000e+00 : f32
    %82 = vector.broadcast %cst_44 : f32 to vector<8x1xf32>
    %83 = arith.maximumf %81, %82 : vector<8x1xf32>
    %c0_45 = arith.constant 0 : index
    %c0_46 = arith.constant 0 : index
    %84 = vector.load %arg6[%c0_45, %c0_46] : memref<8x1xf32, #tpu.memory_space<vmem>>, vector<8x1xf32>
    tpu.vector_store %arg6[%c0_45, %c0_46], %83 {strides = array<i32>} : memref<8x1xf32, #tpu.memory_space<vmem>>, vector<8x1xf32>,
    return
  }
  func.func @transform_0(%arg0: i32) -> (i32, i32) {
    %c0_i32 = arith.constant 0 : i32
    %c0_i32_0 = arith.constant 0 : i32
    return %arg0, %c0_i32 : i32, i32
  }
  func.func @transform_1(%arg0: i32) -> (i32, i32) {
    %c0_i32 = arith.constant 0 : i32
    %c0_i32_0 = arith.constant 0 : i32
    return %arg0, %c0_i32 : i32, i32
  }
  func.func @transform_2(%arg0: i32) -> (i32, i32) {
    %c0_i32 = arith.constant 0 : i32
    %c0_i32_0 = arith.constant 0 : i32
    return %arg0, %c0_i32 : i32, i32
  }
  func.func @transform_3(%arg0: i32) -> (i32, i32) {
    %c0_i32 = arith.constant 0 : i32
    %c0_i32_0 = arith.constant 0 : i32
    %c0_i32_1 = arith.constant 0 : i32
    return %c0_i32, %c0_i32_0 : i32, i32
  }
  func.func @transform_4(%arg0: i32) -> (i32, i32) {
    %c0_i32 = arith.constant 0 : i32
    %c0_i32_0 = arith.constant 0 : i32
    %c0_i32_1 = arith.constant 0 : i32
    return %c0_i32, %c0_i32_0 : i32, i32
  }
  func.func @transform_5(%arg0: i32) -> (i32, i32) {
    %c0_i32 = arith.constant 0 : i32
    %c0_i32_0 = arith.constant 0 : i32
    return %arg0, %c0_i32 : i32, i32
  }
}

</mosaic_0001>

<bundles_post_ra>
// kernel: tpu_custom_call.1
= control target key start
LH: loop header
LB: loop body
LE: loop exit
PB: predicated region body
PF: predicated region fallthrough
CT: control target
= control target key end

     0   :  { %10 = vsyncpa [#allocation3], 0  ;;  %s1867_s0 = inlined_call_operand.hbm [shape: f32[8,24], index: 0, kind: input, shape index: {}]   ;;  %s1868_s1 = inlined_call_operand.hbm [shape: f32[8,64], index: 1, kind: input, shape index: {}]   ;;  %s1869_s2 = inlined_call_operand.hbm [shape: f32[8,32], index: 2, kind: input, shape index: {}]   ;;  %s1870_s3 = inlined_call_operand.hbm [shape: f32[584,512], index: 3, kind: input, shape index: {}]   ;;  %s1871_s4 = inlined_call_operand.hbm [shape: f32[408,128], index: 4, kind: input, shape index: {}]   ;;  %s1872_s5 = inlined_call_operand.vmem [shape: f32[8,1], index: 5, kind: output, shape index: {}]  }
   0x1   :  { %11 = vsyncpa [#allocation5], 0 }
   0x2   :  { %12 = vsyncpa [#allocation8], 0  ;;  %s1753_s18 = smov [#allocation4]   ;;  %s1754_s20 = smov [#allocation7]  }
   0x3   :  { %s29_s19 = sshll.u32 %s1753_s18, 4  ;;  %s48_s21 = sshll.u32 %s1754_s20, 4  ;;  %s30_s19 = int_to_ptr.vmem [resolvable:$true] %s29_s19  ;;  %s49_s21 = int_to_ptr.vmem [resolvable:$true] %s48_s21 }
   0x4   :  { %s1655_s22 = scalar_lea.vmem %s30_s19, 128  ;;  %p1660_p1 = scmp.lt.s32.totalorder %s30_s19, %s30_s19 }
   0x5   :  { %p1656_p0 = scmp.ne.s32.totalorder %s30_s19, %s1655_s22  ;;  %p1661_p2 = scmp.lt.s32.totalorder %s1655_s22, %s1655_s22 }
   0x7   :  { %p1662_p3 = por %p1661_p2, %p1660_p1 }
   0x9   :  { %p1663_p4 = pnand %p1662_p3, %p1656_p0 }
   0xb   :  { %1666 = shalt.err (!%p1663_p4)
}
   0xc   :  { %32 = dma.hbm_to_vmem [thread:$0]  %s1868_s1, 128, %s30_s19, [#allocation5]  }
   0xd   :  { %s1675_s25 = scalar_lea.vmem %s49_s21, 37376  ;;  %p1680_p6 = scmp.lt.s32.totalorder %s49_s21, %s49_s21 }
   0xe   :  { %p1676_p5 = scmp.ne.s32.totalorder %s49_s21, %s1675_s25  ;;  %p1681_p7 = scmp.lt.s32.totalorder %s1675_s25, %s1675_s25 }
  0x10   :  { %p1682_p8 = por %p1681_p7, %p1680_p6 }
  0x12   :  { %p1683_p9 = pnand %p1682_p8, %p1676_p5 }
  0x14   :  { %1686 = shalt.err (!%p1683_p9)
}
  0x15   :  { %s1755_s26 = smov 512   ;;  %s1756_s27 = smov 32  }
  0x16   :  { %54 = dma.hbm_to_vmem [thread:$0]  %s1870_s3, 37376, %s49_s21, [#allocation8], %s1755_s26, %s1755_s26, %s1756_s27  }
  0x17   :  { %s1757_s30 = smov [#allocation2]   ;;  %s1758_s7 = smov [#allocation6]  }
  0x18   :  { %s19_s6 = sshll.u32 %s1757_s30, 4  ;;  %s39_s8 = sshll.u32 %s1758_s7, 4  ;;  %s20_s6 = int_to_ptr.vmem [resolvable:$true] %s19_s6  ;;  %s40_s8 = int_to_ptr.vmem [resolvable:$true] %s39_s8 }
  0x19   :  { %s1695_s1 = scalar_lea.vmem %s20_s6, 128  ;;  %p1700_p11 = scmp.lt.s32.totalorder %s20_s6, %s20_s6 }
  0x1a   :  { %p1696_p10 = scmp.ne.s32.totalorder %s20_s6, %s1695_s1  ;;  %p1701_p12 = scmp.lt.s32.totalorder %s1695_s1, %s1695_s1 }
  0x1c   :  { %p1702_p13 = por %p1701_p12, %p1700_p11 }
  0x1e   :  { %p1703_p0 = pnand %p1702_p13, %p1696_p10 }
  0x20   :  { %1706 = shalt.err (!%p1703_p0)
}
  0x21   :  { %22 = dma.hbm_to_vmem [thread:$0]  %s1867_s0, 128, %s20_s6, [#allocation3]  }
  0x22   :  { %s1715_s11 = scalar_lea.vmem %s40_s8, 128  ;;  %p1720_p2 = scmp.lt.s32.totalorder %s40_s8, %s40_s8 }
  0x23   :  { %p1716_p1 = scmp.ne.s32.totalorder %s40_s8, %s1715_s11  ;;  %p1721_p3 = scmp.lt.s32.totalorder %s1715_s11, %s1715_s11 }
  0x25   :  { %p1722_p4 = por %p1721_p3, %p1720_p2 }
  0x27   :  { %p1723_p5 = pnand %p1722_p4, %p1716_p1 }
  0x29   :  { %1726 = shalt.err (!%p1723_p5)
}
  0x2a   :  { %42 = dma.hbm_to_vmem [thread:$0]  %s1869_s2, 128, %s40_s8, [#allocation5]  }
  0x2b   :  { %s1759_s13 = smov [#allocation9]  }
  0x2c   :  { %s60_s14 = sshll.u32 %s1759_s13, 4  ;;  %s61_s14 = int_to_ptr.vmem [resolvable:$true] %s60_s14 }
  0x2d   :  { %s1735_s15 = scalar_lea.vmem %s61_s14, 6528  ;;  %p1740_p7 = scmp.lt.s32.totalorder %s61_s14, %s61_s14 }
  0x2e   :  { %p1736_p6 = scmp.ne.s32.totalorder %s61_s14, %s1735_s15  ;;  %p1741_p8 = scmp.lt.s32.totalorder %s1735_s15, %s1735_s15 }
  0x30   :  { %p1742_p9 = por %p1741_p8, %p1740_p7 }
  0x32   :  { %p1743_p10 = pnand %p1742_p9, %p1736_p6 }
  0x34   :  { %1746 = shalt.err (!%p1743_p10)
}
  0x35   :  { %s1760_s0 = smov 128   ;;  %s1761_s16 = smov 8  }
  0x36   :  { %66 = dma.hbm_to_vmem [thread:$0]  %s1871_s4, 6528, %s61_s14, [#allocation8], %s1760_s0, %s1760_s0, %s1761_s16  }
  0x37   :  { %1747 = dma.done.wait [#allocation3], 128  }
  0x38   :  { %1748 = vsyncadd [#allocation3], 4294967168 }
  0x39   :  { %1749 = dma.done.wait [#allocation5], 256  }
  0x3a   :  { %1750 = vsyncadd [#allocation5], 4294967040 }
  0x3b   :  { %1751 = dma.done.wait [#allocation8], 43904  }
  0x3c   :  { %1752 = vsyncadd [#allocation8], 4294923392  ;;  %v1762_v0 = vmov 0.0   ;;  %v112_v1 = vld [vmem:[#allocation7 + $0xe8] sm:$0xff]  ;;  %v114_v2 = vld [vmem:[#allocation7 + $0xf8] sm:$0xff]  ;;  %vm138_vm0 = vcmask 523264  }
  0x3d   :  { %206 = vmatprep.mubr.f32.mxu0 %v1762_v0  ;;  %277 = vmatprep.mubr.f32.mxu1 %v1762_v0  ;;  %v111_v3 = vld [vmem:[#allocation7 + $0xe0] sm:$0xff]  ;;  %v113_v4 = vld [vmem:[#allocation7 + $0xf0] sm:$0xff]  ;;  %v108_v5 = vld [vmem:[#allocation7 + $0xc8] sm:$0xff]  ;;  %vm1763_vm1 = vmmov 0   ;;  %vm1005_vm2 = vcmask 261120   ;;  %vm1159_vm3 = vcmask 195584  }
  0x3e   :  { %158 = vmatprep.subr.mxu0 %v112_v1  ;;  %229 = vmatprep.subr.mxu1 %v114_v2  ;;  %v110_v6 = vld [vmem:[#allocation7 + $0xd8] sm:$0xff]  ;;  %v107_v7 = vld [vmem:[#allocation7 + $0xc0] sm:$0xff]  ;;  %v109_v8 = vld [vmem:[#allocation7 + $0xd0] sm:$0xff]  ;;  %vm1234_vm4 = vcmask 64512   ;;  %vm1085_vm5 = vcmask 130048   ;;  %vm1499_vm8 = vcmask 7168  }
  0x3f   :  { %159 = vmatpush1.msra.mxu0 %v111_v3  ;;  %230 = vmatpush1.msra.mxu1 %v113_v4  ;;  %v104_v9 = vld [vmem:[#allocation7 + $0xa8] sm:$0xff]  ;;  %v106_v10 = vld [vmem:[#allocation7 + $0xb8] sm:$0xff]  ;;  %v103_v11 = vld [vmem:[#allocation7 + $0xa0] sm:$0xff] }
  0x40   :  { %160 = vmatprep.subr.mxu0 %v108_v5  ;;  %231 = vmatprep.subr.mxu1 %v110_v6  ;;  %v105_v12 = vld [vmem:[#allocation7 + $0xb0] sm:$0xff]  ;;  %v100_v13 = vld [vmem:[#allocation7 + $0x88] sm:$0xff]  ;;  %v102_v14 = vld [vmem:[#allocation7 + $0x98] sm:$0xff] }
  0x41   :  { %161 = vmatpush1.msra.mxu0 %v107_v7  ;;  %232 = vmatpush1.msra.mxu1 %v109_v8  ;;  %v99_v15 = vld [vmem:[#allocation7 + $0x80] sm:$0xff]  ;;  %v101_v16 = vld [vmem:[#allocation7 + $0x90] sm:$0xff]  ;;  %v96_v17 = vld [vmem:[#allocation7 + $0x68] sm:$0xff] }
  0x42   :  { %162 = vmatprep.subr.mxu0 %v104_v9  ;;  %233 = vmatprep.subr.mxu1 %v106_v10  ;;  %v98_v18 = vld [vmem:[#allocation7 + $0x78] sm:$0xff]  ;;  %v95_v19 = vld [vmem:[#allocation7 + $0x60] sm:$0xff]  ;;  %v97_v20 = vld [vmem:[#allocation7 + $0x70] sm:$0xff] }
  0x43   :  { %163 = vmatpush1.msra.mxu0 %v103_v11  ;;  %234 = vmatpush1.msra.mxu1 %v105_v12  ;;  %v92_v21 = vld [vmem:[#allocation7 + $0x48] sm:$0xff]  ;;  %v94_v22 = vld [vmem:[#allocation7 + $0x58] sm:$0xff]  ;;  %v91_v23 = vld [vmem:[#allocation7 + $0x40] sm:$0xff] }
  0x44   :  { %164 = vmatprep.subr.mxu0 %v100_v13  ;;  %235 = vmatprep.subr.mxu1 %v102_v14  ;;  %v93_v24 = vld [vmem:[#allocation7 + $0x50] sm:$0xff]  ;;  %v88_v25 = vld [vmem:[#allocation7 + $0x28] sm:$0xff]  ;;  %v90_v26 = vld [vmem:[#allocation7 + $0x38] sm:$0xff] }
  0x45   :  { %165 = vmatpush1.msra.mxu0 %v99_v15  ;;  %236 = vmatpush1.msra.mxu1 %v101_v16  ;;  %v87_v27 = vld [vmem:[#allocation7 + $0x20] sm:$0xff]  ;;  %v89_v28 = vld [vmem:[#allocation7 + $0x30] sm:$0xff]  ;;  %v84_v29 = vld [vmem:[#allocation7 + $0x8] sm:$0xff] }
  0x46   :  { %166 = vmatprep.subr.mxu0 %v96_v17  ;;  %237 = vmatprep.subr.mxu1 %v98_v18  ;;  %v86_v30 = vld [vmem:[#allocation7 + $0x18] sm:$0xff]  ;;  %v83_v31 = vld [vmem:[#allocation7] sm:$0xff]  ;;  %v85_v32 = vld [vmem:[#allocation7 + $0x10] sm:$0xff] }
  0x47   :  { %167 = vmatpush1.msra.mxu0 %v95_v19  ;;  %238 = vmatpush1.msra.mxu1 %v97_v20  ;;  %v82_v33 = vld [vmem:[#allocation4] sm:$0xff]  ;;  %v351_v34 = vld [vmem:[#allocation7 + $0x2e8] sm:$0xff]  ;;  %v353_v35 = vld [vmem:[#allocation7 + $0x2f8] sm:$0xff] }
  0x48   :  { %168 = vmatprep.subr.mxu0 %v92_v21  ;;  %239 = vmatprep.subr.mxu1 %v94_v22  ;;  %v350_v36 = vld [vmem:[#allocation7 + $0x2e0] sm:$0xff]  ;;  %v352_v37 = vld [vmem:[#allocation7 + $0x2f0] sm:$0xff]  ;;  %v347_v38 = vld [vmem:[#allocation7 + $0x2c8] sm:$0xff] }
  0x49   :  { %169 = vmatpush1.msra.mxu0 %v91_v23  ;;  %240 = vmatpush1.msra.mxu1 %v93_v24  ;;  %v349_v39 = vld [vmem:[#allocation7 + $0x2d8] sm:$0xff]  ;;  %v346_v40 = vld [vmem:[#allocation7 + $0x2c0] sm:$0xff]  ;;  %v348_v41 = vld [vmem:[#allocation7 + $0x2d0] sm:$0xff] }
  0x4a   :  { %170 = vmatprep.subr.mxu0 %v88_v25  ;;  %241 = vmatprep.subr.mxu1 %v90_v26  ;;  %v343_v42 = vld [vmem:[#allocation7 + $0x2a8] sm:$0xff]  ;;  %v345_v43 = vld [vmem:[#allocation7 + $0x2b8] sm:$0xff]  ;;  %v342_v44 = vld [vmem:[#allocation7 + $0x2a0] sm:$0xff] }
  0x4b   :  { %171 = vmatpush1.msra.mxu0 %v87_v27  ;;  %242 = vmatpush1.msra.mxu1 %v89_v28  ;;  %v344_v45 = vld [vmem:[#allocation7 + $0x2b0] sm:$0xff]  ;;  %v339_v46 = vld [vmem:[#allocation7 + $0x288] sm:$0xff]  ;;  %v341_v47 = vld [vmem:[#allocation7 + $0x298] sm:$0xff] }
  0x4c   :  { %172 = vmatprep.subr.mxu0 %v84_v29  ;;  %243 = vmatprep.subr.mxu1 %v86_v30  ;;  %v338_v48 = vld [vmem:[#allocation7 + $0x280] sm:$0xff]  ;;  %v340_v49 = vld [vmem:[#allocation7 + $0x290] sm:$0xff]  ;;  %v335_v50 = vld [vmem:[#allocation7 + $0x268] sm:$0xff] }
  0x4d   :  { %173 = vmatpush1.msra.mxu0 %v83_v31  ;;  %244 = vmatpush1.msra.mxu1 %v85_v32  ;;  %v337_v51 = vld [vmem:[#allocation7 + $0x278] sm:$0xff]  ;;  %v334_v52 = vld [vmem:[#allocation7 + $0x260] sm:$0xff]  ;;  %v336_v53 = vld [vmem:[#allocation7 + $0x270] sm:$0xff] }
  0x4e   :  { %1508 = vmatmul.mubr.msk.f32.vlgmr.msra.gmra.mxu0 %vm138_vm0, %v82_v33  ;;  %1509 = vmatmul.mubr.msk.f32.vlgmr.msra.gmra.mxu1 %vm138_vm0, %v82_v33  ;;  %v331_v54 = vld [vmem:[#allocation7 + $0x248] sm:$0xff]  ;;  %v333_v55 = vld [vmem:[#allocation7 + $0x258] sm:$0xff]  ;;  %v330_v56 = vld [vmem:[#allocation7 + $0x240] sm:$0xff] }
  0x4f   :  { %441 = vmatprep.subr.mxu0 %v351_v34  ;;  %512 = vmatprep.subr.mxu1 %v353_v35  ;;  %v332_v57 = vld [vmem:[#allocation7 + $0x250] sm:$0xff]  ;;  %v327_v58 = vld [vmem:[#allocation7 + $0x228] sm:$0xff]  ;;  %v329_v59 = vld [vmem:[#allocation7 + $0x238] sm:$0xff] }
  0x50   :  { %442 = vmatpush1.msra.mxu0 %v350_v36  ;;  %513 = vmatpush1.msra.mxu1 %v352_v37  ;;  %v326_v60 = vld [vmem:[#allocation7 + $0x220] sm:$0xff]  ;;  %v328_v61 = vld [vmem:[#allocation7 + $0x230] sm:$0xff]  ;;  %v323_v62 = vld [vmem:[#allocation7 + $0x208] sm:$0xff] }
  0x51   :  { %443 = vmatprep.subr.mxu0 %v347_v38  ;;  %514 = vmatprep.subr.mxu1 %v349_v39  ;;  %v325_v63 = vld [vmem:[#allocation7 + $0x218] sm:$0xff]  ;;  %v322_v1 = vld [vmem:[#allocation7 + $0x200] sm:$0xff]  ;;  %v324_v2 = vld [vmem:[#allocation7 + $0x210] sm:$0xff] }
  0x52   :  { %444 = vmatpush1.msra.mxu0 %v346_v40  ;;  %515 = vmatpush1.msra.mxu1 %v348_v41  ;;  %v319_v3 = vld [vmem:[#allocation7 + $0x1e8] sm:$0xff]  ;;  %v321_v4 = vld [vmem:[#allocation7 + $0x1f8] sm:$0xff]  ;;  %v318_v5 = vld [vmem:[#allocation7 + $0x1e0] sm:$0xff] }
  0x53   :  { %445 = vmatprep.subr.mxu0 %v343_v42  ;;  %516 = vmatprep.subr.mxu1 %v345_v43  ;;  %v320_v6 = vld [vmem:[#allocation7 + $0x1f0] sm:$0xff]  ;;  %v315_v7 = vld [vmem:[#allocation7 + $0x1c8] sm:$0xff]  ;;  %v317_v8 = vld [vmem:[#allocation7 + $0x1d8] sm:$0xff] }
  0x54   :  { %446 = vmatpush1.msra.mxu0 %v342_v44  ;;  %517 = vmatpush1.msra.mxu1 %v344_v45  ;;  %v314_v9 = vld [vmem:[#allocation7 + $0x1c0] sm:$0xff]  ;;  %v316_v10 = vld [vmem:[#allocation7 + $0x1d0] sm:$0xff]  ;;  %v311_v11 = vld [vmem:[#allocation7 + $0x1a8] sm:$0xff] }
  0x55   :  { %447 = vmatprep.subr.mxu0 %v339_v46  ;;  %518 = vmatprep.subr.mxu1 %v341_v47  ;;  %v313_v12 = vld [vmem:[#allocation7 + $0x1b8] sm:$0xff]  ;;  %v310_v13 = vld [vmem:[#allocation7 + $0x1a0] sm:$0xff]  ;;  %v312_v14 = vld [vmem:[#allocation7 + $0x1b0] sm:$0xff] }
  0x56   :  { %448 = vmatpush1.msra.mxu0 %v338_v48  ;;  %519 = vmatpush1.msra.mxu1 %v340_v49  ;;  %v307_v15 = vld [vmem:[#allocation7 + $0x188] sm:$0xff]  ;;  %v309_v16 = vld [vmem:[#allocation7 + $0x198] sm:$0xff]  ;;  %v306_v17 = vld [vmem:[#allocation7 + $0x180] sm:$0xff] }
  0x57   :  { %449 = vmatprep.subr.mxu0 %v335_v50  ;;  %520 = vmatprep.subr.mxu1 %v337_v51  ;;  %v308_v18 = vld [vmem:[#allocation7 + $0x190] sm:$0xff]  ;;  %v303_v19 = vld [vmem:[#allocation7 + $0x168] sm:$0xff]  ;;  %v305_v20 = vld [vmem:[#allocation7 + $0x178] sm:$0xff] }
  0x58   :  { %450 = vmatpush1.msra.mxu0 %v334_v52  ;;  %521 = vmatpush1.msra.mxu1 %v336_v53  ;;  %v302_v21 = vld [vmem:[#allocation7 + $0x160] sm:$0xff]  ;;  %v304_v22 = vld [vmem:[#allocation7 + $0x170] sm:$0xff]  ;;  %v299_v23 = vld [vmem:[#allocation7 + $0x148] sm:$0xff] }
  0x59   :  { %451 = vmatprep.subr.mxu0 %v331_v54  ;;  %522 = vmatprep.subr.mxu1 %v333_v55  ;;  %v301_v24 = vld [vmem:[#allocation7 + $0x158] sm:$0xff]  ;;  %v298_v25 = vld [vmem:[#allocation7 + $0x140] sm:$0xff]  ;;  %v300_v26 = vld [vmem:[#allocation7 + $0x150] sm:$0xff] }
  0x5a   :  { %452 = vmatpush1.msra.mxu0 %v330_v56  ;;  %523 = vmatpush1.msra.mxu1 %v332_v57  ;;  %v295_v27 = vld [vmem:[#allocation7 + $0x128] sm:$0xff]  ;;  %v297_v28 = vld [vmem:[#allocation7 + $0x138] sm:$0xff]  ;;  %v294_v29 = vld [vmem:[#allocation7 + $0x120] sm:$0xff] }
  0x5b   :  { %453 = vmatprep.subr.mxu0 %v327_v58  ;;  %524 = vmatprep.subr.mxu1 %v329_v59  ;;  %v296_v30 = vld [vmem:[#allocation7 + $0x130] sm:$0xff]  ;;  %v291_v31 = vld [vmem:[#allocation7 + $0x108] sm:$0xff]  ;;  %v293_v32 = vld [vmem:[#allocation7 + $0x118] sm:$0xff] }
  0x5c   :  { %454 = vmatpush1.msra.mxu0 %v326_v60  ;;  %525 = vmatpush1.msra.mxu1 %v328_v61  ;;  %v290_v33 = vld [vmem:[#allocation7 + $0x100] sm:$0xff]  ;;  %v292_v34 = vld [vmem:[#allocation7 + $0x110] sm:$0xff]  ;;  %v415_v35 = vld [vmem:[#allocation7 + $0x4e8] sm:$0xff] }
  0x5d   :  { %455 = vmatprep.subr.mxu0 %v323_v62  ;;  %526 = vmatprep.subr.mxu1 %v325_v63  ;;  %v417_v36 = vld [vmem:[#allocation7 + $0x4f8] sm:$0xff]  ;;  %v414_v37 = vld [vmem:[#allocation7 + $0x4e0] sm:$0xff]  ;;  %v416_v38 = vld [vmem:[#allocation7 + $0x4f0] sm:$0xff] }
  0x5e   :  { %456 = vmatpush1.msra.mxu0 %v322_v1  ;;  %527 = vmatpush1.msra.mxu1 %v324_v2  ;;  %v411_v39 = vld [vmem:[#allocation7 + $0x4c8] sm:$0xff]  ;;  %v413_v40 = vld [vmem:[#allocation7 + $0x4d8] sm:$0xff]  ;;  %v410_v41 = vld [vmem:[#allocation7 + $0x4c0] sm:$0xff] }
  0x5f   :  { %457 = vmatprep.subr.mxu0 %v319_v3  ;;  %528 = vmatprep.subr.mxu1 %v321_v4  ;;  %v412_v42 = vld [vmem:[#allocation7 + $0x4d0] sm:$0xff]  ;;  %v407_v43 = vld [vmem:[#allocation7 + $0x4a8] sm:$0xff]  ;;  %v409_v44 = vld [vmem:[#allocation7 + $0x4b8] sm:$0xff] }
  0x60   :  { %458 = vmatpush1.msra.mxu0 %v318_v5  ;;  %529 = vmatpush1.msra.mxu1 %v320_v6  ;;  %v406_v45 = vld [vmem:[#allocation7 + $0x4a0] sm:$0xff]  ;;  %v408_v46 = vld [vmem:[#allocation7 + $0x4b0] sm:$0xff]  ;;  %v403_v47 = vld [vmem:[#allocation7 + $0x488] sm:$0xff] }
  0x61   :  { %459 = vmatprep.subr.mxu0 %v315_v7  ;;  %530 = vmatprep.subr.mxu1 %v317_v8  ;;  %v405_v48 = vld [vmem:[#allocation7 + $0x498] sm:$0xff]  ;;  %v402_v49 = vld [vmem:[#allocation7 + $0x480] sm:$0xff]  ;;  %v404_v50 = vld [vmem:[#allocation7 + $0x490] sm:$0xff] }
  0x62   :  { %460 = vmatpush1.msra.mxu0 %v314_v9  ;;  %531 = vmatpush1.msra.mxu1 %v316_v10  ;;  %v399_v51 = vld [vmem:[#allocation7 + $0x468] sm:$0xff]  ;;  %v401_v52 = vld [vmem:[#allocation7 + $0x478] sm:$0xff]  ;;  %v398_v53 = vld [vmem:[#allocation7 + $0x460] sm:$0xff] }
  0x63   :  { %461 = vmatprep.subr.mxu0 %v311_v11  ;;  %532 = vmatprep.subr.mxu1 %v313_v12  ;;  %v400_v54 = vld [vmem:[#allocation7 + $0x470] sm:$0xff]  ;;  %v395_v55 = vld [vmem:[#allocation7 + $0x448] sm:$0xff]  ;;  %v397_v56 = vld [vmem:[#allocation7 + $0x458] sm:$0xff] }
  0x64   :  { %462 = vmatpush1.msra.mxu0 %v310_v13  ;;  %533 = vmatpush1.msra.mxu1 %v312_v14  ;;  %v394_v57 = vld [vmem:[#allocation7 + $0x440] sm:$0xff]  ;;  %v396_v58 = vld [vmem:[#allocation7 + $0x450] sm:$0xff]  ;;  %v391_v59 = vld [vmem:[#allocation7 + $0x428] sm:$0xff] }
  0x65   :  { %463 = vmatprep.subr.mxu0 %v307_v15  ;;  %534 = vmatprep.subr.mxu1 %v309_v16  ;;  %v393_v60 = vld [vmem:[#allocation7 + $0x438] sm:$0xff]  ;;  %v390_v61 = vld [vmem:[#allocation7 + $0x420] sm:$0xff]  ;;  %v392_v62 = vld [vmem:[#allocation7 + $0x430] sm:$0xff] }
  0x66   :  { %464 = vmatpush1.msra.mxu0 %v306_v17  ;;  %535 = vmatpush1.msra.mxu1 %v308_v18  ;;  %v387_v63 = vld [vmem:[#allocation7 + $0x408] sm:$0xff]  ;;  %v389_v1 = vld [vmem:[#allocation7 + $0x418] sm:$0xff]  ;;  %v386_v2 = vld [vmem:[#allocation7 + $0x400] sm:$0xff] }
  0x67   :  { %465 = vmatprep.subr.mxu0 %v303_v19  ;;  %536 = vmatprep.subr.mxu1 %v305_v20  ;;  %v388_v3 = vld [vmem:[#allocation7 + $0x410] sm:$0xff]  ;;  %v383_v4 = vld [vmem:[#allocation7 + $0x3e8] sm:$0xff]  ;;  %v385_v5 = vld [vmem:[#allocation7 + $0x3f8] sm:$0xff] }
  0x68   :  { %466 = vmatpush1.msra.mxu0 %v302_v21  ;;  %537 = vmatpush1.msra.mxu1 %v304_v22  ;;  %v382_v6 = vld [vmem:[#allocation7 + $0x3e0] sm:$0xff]  ;;  %v384_v7 = vld [vmem:[#allocation7 + $0x3f0] sm:$0xff]  ;;  %v379_v8 = vld [vmem:[#allocation7 + $0x3c8] sm:$0xff] }
  0x69   :  { %467 = vmatprep.subr.mxu0 %v299_v23  ;;  %538 = vmatprep.subr.mxu1 %v301_v24  ;;  %v381_v9 = vld [vmem:[#allocation7 + $0x3d8] sm:$0xff]  ;;  %v378_v10 = vld [vmem:[#allocation7 + $0x3c0] sm:$0xff]  ;;  %v380_v11 = vld [vmem:[#allocation7 + $0x3d0] sm:$0xff] }
  0x6a   :  { %468 = vmatpush1.msra.mxu0 %v298_v25  ;;  %539 = vmatpush1.msra.mxu1 %v300_v26  ;;  %v375_v12 = vld [vmem:[#allocation7 + $0x3a8] sm:$0xff]  ;;  %v377_v13 = vld [vmem:[#allocation7 + $0x3b8] sm:$0xff]  ;;  %v374_v14 = vld [vmem:[#allocation7 + $0x3a0] sm:$0xff] }
  0x6b   :  { %469 = vmatprep.subr.mxu0 %v295_v27  ;;  %540 = vmatprep.subr.mxu1 %v297_v28  ;;  %v376_v15 = vld [vmem:[#allocation7 + $0x3b0] sm:$0xff]  ;;  %v371_v16 = vld [vmem:[#allocation7 + $0x388] sm:$0xff]  ;;  %v373_v17 = vld [vmem:[#allocation7 + $0x398] sm:$0xff] }
  0x6c   :  { %470 = vmatpush1.msra.mxu0 %v294_v29  ;;  %541 = vmatpush1.msra.mxu1 %v296_v30  ;;  %v370_v18 = vld [vmem:[#allocation7 + $0x380] sm:$0xff]  ;;  %v372_v19 = vld [vmem:[#allocation7 + $0x390] sm:$0xff]  ;;  %v367_v20 = vld [vmem:[#allocation7 + $0x368] sm:$0xff] }
  0x6d   :  { %471 = vmatprep.subr.mxu0 %v291_v31  ;;  %542 = vmatprep.subr.mxu1 %v293_v32  ;;  %v369_v21 = vld [vmem:[#allocation7 + $0x378] sm:$0xff]  ;;  %v366_v22 = vld [vmem:[#allocation7 + $0x360] sm:$0xff]  ;;  %v368_v23 = vld [vmem:[#allocation7 + $0x370] sm:$0xff] }
  0x6e   :  { %472 = vmatpush1.msra.mxu0 %v290_v33  ;;  %543 = vmatpush1.msra.mxu1 %v292_v34  ;;  %v363_v24 = vld [vmem:[#allocation7 + $0x348] sm:$0xff]  ;;  %v365_v25 = vld [vmem:[#allocation7 + $0x358] sm:$0xff]  ;;  %v362_v26 = vld [vmem:[#allocation7 + $0x340] sm:$0xff] }
  0x6f   :  { %473 = vmatprep.subr.mxu0 %v415_v35  ;;  %544 = vmatprep.subr.mxu1 %v417_v36  ;;  %v364_v27 = vld [vmem:[#allocation7 + $0x350] sm:$0xff]  ;;  %v359_v28 = vld [vmem:[#allocation7 + $0x328] sm:$0xff]  ;;  %v361_v29 = vld [vmem:[#allocation7 + $0x338] sm:$0xff] }
  0x70   :  { %474 = vmatpush2.msra.mxu0 %v414_v37  ;;  %545 = vmatpush2.msra.mxu1 %v416_v38  ;;  %v358_v30 = vld [vmem:[#allocation7 + $0x320] sm:$0xff]  ;;  %v360_v31 = vld [vmem:[#allocation7 + $0x330] sm:$0xff]  ;;  %v355_v32 = vld [vmem:[#allocation7 + $0x308] sm:$0xff]  ;;  %v118_v38 = vlaneseq }
  0x71   :  { %475 = vmatprep.subr.mxu0 %v411_v39  ;;  %546 = vmatprep.subr.mxu1 %v413_v40  ;;  %v357_v33 = vld [vmem:[#allocation7 + $0x318] sm:$0xff]  ;;  %v354_v34 = vld [vmem:[#allocation7 + $0x300] sm:$0xff]  ;;  %v356_v35 = vld [vmem:[#allocation7 + $0x310] sm:$0xff] }
  0x72   :  { %476 = vmatpush2.msra.mxu0 %v410_v41  ;;  %547 = vmatpush2.msra.mxu1 %v412_v42  ;;  %v650_v36 = vld [vmem:[#allocation7 + $0x6e8] sm:$0xff]  ;;  %v652_v37 = vld [vmem:[#allocation7 + $0x6f8] sm:$0xff]  ;;  %v119_v39 = vshrl.u32 %v118_v38, 7 }
  0x73   :  { %477 = vmatprep.subr.mxu0 %v407_v43  ;;  %548 = vmatprep.subr.mxu1 %v409_v44  ;;  %v116_v42 = vld [vmem:[#allocation7 + $0x900] ss:$8 sm:$0xf] }
  0x74   :  { %478 = vmatpush2.msra.mxu0 %v406_v45  ;;  %549 = vmatpush2.msra.mxu1 %v408_v46  ;;  %v1811_v40 = vsub.s32 0, %v119_v39  ;;  %v1813_v41 = vsub.s32 2, %v119_v39  ;;  %v1815_v43 = vsub.s32 1, %v119_v39  ;;  %v1817_v44 = vsub.s32 3, %v119_v39  ;;  %v610_v38 = vld [vmem:[#allocation7 + $0x5a8] sm:$0xff]  ;;  %v612_v39 = vld [vmem:[#allocation7 + $0x5b8] sm:$0xff] }
  0x75   :  { %479 = vmatprep.subr.mxu0 %v403_v47  ;;  %550 = vmatprep.subr.mxu1 %v405_v48 }
  0x76   :  { %480 = vmatpush2.msra.mxu0 %v402_v49  ;;  %551 = vmatpush2.msra.mxu1 %v404_v50  ;;  %v121_v45 = vrot.slane %v116_v42, %v1811_v40  ;;  %v129_v46 = vrot.slane %v116_v42, %v1813_v41  ;;  %v125_v47 = vrot.slane %v116_v42, %v1815_v43 }
  0x77   :  { %481 = vmatprep.subr.mxu0 %v399_v51  ;;  %552 = vmatprep.subr.mxu1 %v401_v52  ;;  %v133_v48 = vrot.slane %v116_v42, %v1817_v44  ;;  %v609_v42 = vld [vmem:[#allocation7 + $0x5a0] sm:$0xff] }
  0x78   :  { %482 = vmatpush2.msra.mxu0 %v398_v53  ;;  %553 = vmatpush2.msra.mxu1 %v400_v54 }
  0x79   :  { %483 = vmatprep.subr.mxu0 %v395_v55  ;;  %554 = vmatprep.subr.mxu1 %v397_v56 }
  0x7a   :  { %484 = vmatpush2.msra.mxu0 %v394_v57  ;;  %555 = vmatpush2.msra.mxu1 %v396_v58 }
  0x7b   :  { %485 = vmatprep.subr.mxu0 %v391_v59  ;;  %556 = vmatprep.subr.mxu1 %v393_v60 }
  0x7c   :  { %486 = vmatpush2.msra.mxu0 %v390_v61  ;;  %557 = vmatpush2.msra.mxu1 %v392_v62 }
  0x7d   :  { %487 = vmatprep.subr.mxu0 %v387_v63  ;;  %558 = vmatprep.subr.mxu1 %v389_v1  ;;  %v649_v63 = vld [vmem:[#allocation7 + $0x6e0] sm:$0xff]  ;;  %v651_v1 = vld [vmem:[#allocation7 + $0x6f0] sm:$0xff] }
  0x7e   :  { %488 = vmatpush2.msra.mxu0 %v386_v2  ;;  %559 = vmatpush2.msra.mxu1 %v388_v3  ;;  %v646_v2 = vld [vmem:[#allocation7 + $0x6c8] sm:$0xff]  ;;  %v648_v3 = vld [vmem:[#allocation7 + $0x6d8] sm:$0xff] }
  0x7f   :  { %489 = vmatprep.subr.mxu0 %v383_v4  ;;  %560 = vmatprep.subr.mxu1 %v385_v5  ;;  %v645_v4 = vld [vmem:[#allocation7 + $0x6c0] sm:$0xff]  ;;  %v647_v5 = vld [vmem:[#allocation7 + $0x6d0] sm:$0xff] }
  0x80   :  { %490 = vmatpush2.msra.mxu0 %v382_v6  ;;  %561 = vmatpush2.msra.mxu1 %v384_v7  ;;  %v642_v6 = vld [vmem:[#allocation7 + $0x6a8] sm:$0xff]  ;;  %v644_v7 = vld [vmem:[#allocation7 + $0x6b8] sm:$0xff] }
  0x81   :  { %491 = vmatprep.subr.mxu0 %v379_v8  ;;  %562 = vmatprep.subr.mxu1 %v381_v9  ;;  %v641_v8 = vld [vmem:[#allocation7 + $0x6a0] sm:$0xff]  ;;  %v643_v9 = vld [vmem:[#allocation7 + $0x6b0] sm:$0xff] }
  0x82   :  { %492 = vmatpush2.msra.mxu0 %v378_v10  ;;  %563 = vmatpush2.msra.mxu1 %v380_v11  ;;  %v638_v10 = vld [vmem:[#allocation7 + $0x688] sm:$0xff]  ;;  %v640_v11 = vld [vmem:[#allocation7 + $0x698] sm:$0xff] }
  0x83   :  { %493 = vmatprep.subr.mxu0 %v375_v12  ;;  %564 = vmatprep.subr.mxu1 %v377_v13  ;;  %v637_v12 = vld [vmem:[#allocation7 + $0x680] sm:$0xff]  ;;  %v639_v13 = vld [vmem:[#allocation7 + $0x690] sm:$0xff] }
  0x84   :  { %494 = vmatpush2.msra.mxu0 %v374_v14  ;;  %565 = vmatpush2.msra.mxu1 %v376_v15  ;;  %v634_v14 = vld [vmem:[#allocation7 + $0x668] sm:$0xff]  ;;  %v636_v15 = vld [vmem:[#allocation7 + $0x678] sm:$0xff] }
  0x85   :  { %495 = vmatprep.subr.mxu0 %v371_v16  ;;  %566 = vmatprep.subr.mxu1 %v373_v17  ;;  %v633_v16 = vld [vmem:[#allocation7 + $0x660] sm:$0xff]  ;;  %v635_v17 = vld [vmem:[#allocation7 + $0x670] sm:$0xff] }
  0x86   :  { %496 = vmatpush2.msra.mxu0 %v370_v18  ;;  %567 = vmatpush2.msra.mxu1 %v372_v19  ;;  %v630_v18 = vld [vmem:[#allocation7 + $0x648] sm:$0xff]  ;;  %v632_v19 = vld [vmem:[#allocation7 + $0x658] sm:$0xff] }
  0x87   :  { %497 = vmatprep.subr.mxu0 %v367_v20  ;;  %568 = vmatprep.subr.mxu1 %v369_v21  ;;  %v629_v20 = vld [vmem:[#allocation7 + $0x640] sm:$0xff]  ;;  %v631_v21 = vld [vmem:[#allocation7 + $0x650] sm:$0xff] }
  0x88   :  { %498 = vmatpush2.msra.mxu0 %v366_v22  ;;  %569 = vmatpush2.msra.mxu1 %v368_v23  ;;  %v626_v22 = vld [vmem:[#allocation7 + $0x628] sm:$0xff]  ;;  %v628_v23 = vld [vmem:[#allocation7 + $0x638] sm:$0xff] }
  0x89   :  { %499 = vmatprep.subr.mxu0 %v363_v24  ;;  %570 = vmatprep.subr.mxu1 %v365_v25  ;;  %v625_v24 = vld [vmem:[#allocation7 + $0x620] sm:$0xff]  ;;  %v627_v25 = vld [vmem:[#allocation7 + $0x630] sm:$0xff] }
  0x8a   :  { %500 = vmatpush2.msra.mxu0 %v362_v26  ;;  %571 = vmatpush2.msra.mxu1 %v364_v27  ;;  %v622_v26 = vld [vmem:[#allocation7 + $0x608] sm:$0xff]  ;;  %v624_v27 = vld [vmem:[#allocation7 + $0x618] sm:$0xff] }
  0x8b   :  { %501 = vmatprep.subr.mxu0 %v359_v28  ;;  %572 = vmatprep.subr.mxu1 %v361_v29  ;;  %v621_v28 = vld [vmem:[#allocation7 + $0x600] sm:$0xff]  ;;  %v623_v29 = vld [vmem:[#allocation7 + $0x610] sm:$0xff] }
  0x8c   :  { %502 = vmatpush2.msra.mxu0 %v358_v30  ;;  %573 = vmatpush2.msra.mxu1 %v360_v31  ;;  %v618_v30 = vld [vmem:[#allocation7 + $0x5e8] sm:$0xff]  ;;  %v620_v31 = vld [vmem:[#allocation7 + $0x5f8] sm:$0xff] }
  0x8d   :  { %503 = vmatprep.subr.mxu0 %v355_v32  ;;  %574 = vmatprep.subr.mxu1 %v357_v33  ;;  %v617_v32 = vld [vmem:[#allocation7 + $0x5e0] sm:$0xff]  ;;  %v619_v33 = vld [vmem:[#allocation7 + $0x5f0] sm:$0xff] }
  0x8e   :  { %504 = vmatpush2.msra.mxu0 %v354_v34  ;;  %575 = vmatpush2.msra.mxu1 %v356_v35  ;;  %v614_v34 = vld [vmem:[#allocation7 + $0x5c8] sm:$0xff]  ;;  %v616_v35 = vld [vmem:[#allocation7 + $0x5d8] sm:$0xff] }
  0x8f   :  { %740 = vmatprep.subr.mxu0 %v650_v36  ;;  %811 = vmatprep.subr.mxu1 %v652_v37  ;;  %v613_v36 = vld [vmem:[#allocation7 + $0x5c0] sm:$0xff]  ;;  %v615_v37 = vld [vmem:[#allocation7 + $0x5d0] sm:$0xff] }
 0x10e   :  { %v208_v49 = vpop.f32.mrf.mxu0  ;;  %v279_v50 = vpop.f32.mrf.mxu1 }
 0x10f   :  { %v209_v51 = vadd.f32 %v208_v49, %v121_v45  ;;  %v280_v52 = vadd.f32 %v279_v50, %v129_v46  ;;  %v611_v45 = vld [vmem:[#allocation7 + $0x5b0] sm:$0xff]  ;;  %v606_v46 = vld [vmem:[#allocation7 + $0x588] sm:$0xff] }
 0x110   :  { %v210_v53 = vpop.f32.mrf.mxu0  ;;  %v281_v54 = vpop.f32.mrf.mxu1  ;;  %v607_v49 = vld [vmem:[#allocation7 + $0x590] sm:$0xff]  ;;  %v602_v50 = vld [vmem:[#allocation7 + $0x568] sm:$0xff] }
 0x111   :  { %v211_v55 = vadd.f32 %v210_v53, %v125_v47  ;;  %v282_v56 = vadd.f32 %v281_v54, %v133_v48  ;;  %v284_v57 = vmax.f32 %v209_v51, 0.0  ;;  %v286_v58 = vmax.f32 %v280_v52, 0.0  ;;  %v608_v47 = vld [vmem:[#allocation7 + $0x598] sm:$0xff]  ;;  %v605_v48 = vld [vmem:[#allocation7 + $0x580] sm:$0xff]  ;;  %v603_v53 = vld [vmem:[#allocation7 + $0x570] sm:$0xff] }
 0x112   :  { %v604_v51 = vld [vmem:[#allocation7 + $0x578] sm:$0xff]  ;;  %v601_v52 = vld [vmem:[#allocation7 + $0x560] sm:$0xff]  ;;  %v598_v54 = vld [vmem:[#allocation7 + $0x548] sm:$0xff] }
 0x113   :  { %v285_v59 = vmax.f32 %v211_v55, 0.0  ;;  %v287_v60 = vmax.f32 %v282_v56, 0.0  ;;  %v288_v62 = vmax.f32 %v284_v57, %v286_v58  ;;  %v600_v55 = vld [vmem:[#allocation7 + $0x558] sm:$0xff]  ;;  %v597_v56 = vld [vmem:[#allocation7 + $0x540] sm:$0xff]  ;;  %v599_v57 = vld [vmem:[#allocation7 + $0x550] sm:$0xff] }
 0x114   :  { %v594_v58 = vld [vmem:[#allocation7 + $0x528] sm:$0xff] }
 0x115   :  { %v289_v61 = vmax.f32 %v285_v59, %v287_v60  ;;  %v596_v59 = vld [vmem:[#allocation7 + $0x538] sm:$0xff]  ;;  %v593_v60 = vld [vmem:[#allocation7 + $0x520] sm:$0xff] }
 0x117   :  { %505 = vmatprep.mubr.f32.mxu0 %v289_v61  ;;  %576 = vmatprep.mubr.f32.mxu1 %v289_v61  ;;  %v595_v61 = vld [vmem:[#allocation7 + $0x530] sm:$0xff] }
 0x118   :  { %506 = vmatmul.mubr.f32.vlgmr.msra.gmra.mxu0 %v288_v62  ;;  %577 = vmatmul.mubr.f32.vlgmr.msra.gmra.mxu1 %v288_v62  ;;  %v590_v62 = vld [vmem:[#allocation7 + $0x508] sm:$0xff] }
 0x119   :  { %741 = vmatpush1.msra.mxu0 %v649_v63  ;;  %812 = vmatpush1.msra.mxu1 %v651_v1  ;;  %v592_v63 = vld [vmem:[#allocation7 + $0x518] sm:$0xff]  ;;  %v589_v1 = vld [vmem:[#allocation7 + $0x500] sm:$0xff] }
 0x11a   :  { %742 = vmatprep.subr.mxu0 %v646_v2  ;;  %813 = vmatprep.subr.mxu1 %v648_v3  ;;  %v591_v2 = vld [vmem:[#allocation7 + $0x510] sm:$0xff]  ;;  %v714_v3 = vld [vmem:[#allocation7 + $0x8e8] sm:$0xff] }
 0x11b   :  { %743 = vmatpush1.msra.mxu0 %v645_v4  ;;  %814 = vmatpush1.msra.mxu1 %v647_v5  ;;  %v716_v4 = vld [vmem:[#allocation7 + $0x8f8] sm:$0xff]  ;;  %v713_v5 = vld [vmem:[#allocation7 + $0x8e0] sm:$0xff] }
 0x11c   :  { %744 = vmatprep.subr.mxu0 %v642_v6  ;;  %815 = vmatprep.subr.mxu1 %v644_v7  ;;  %v715_v6 = vld [vmem:[#allocation7 + $0x8f0] sm:$0xff]  ;;  %v710_v7 = vld [vmem:[#allocation7 + $0x8c8] sm:$0xff] }
 0x11d   :  { %745 = vmatpush1.msra.mxu0 %v641_v8  ;;  %816 = vmatpush1.msra.mxu1 %v643_v9  ;;  %v712_v8 = vld [vmem:[#allocation7 + $0x8d8] sm:$0xff]  ;;  %v709_v9 = vld [vmem:[#allocation7 + $0x8c0] sm:$0xff] }
 0x11e   :  { %746 = vmatprep.subr.mxu0 %v638_v10  ;;  %817 = vmatprep.subr.mxu1 %v640_v11  ;;  %v711_v10 = vld [vmem:[#allocation7 + $0x8d0] sm:$0xff]  ;;  %v706_v11 = vld [vmem:[#allocation7 + $0x8a8] sm:$0xff] }
 0x11f   :  { %747 = vmatpush1.msra.mxu0 %v637_v12  ;;  %818 = vmatpush1.msra.mxu1 %v639_v13  ;;  %v708_v12 = vld [vmem:[#allocation7 + $0x8b8] sm:$0xff]  ;;  %v705_v13 = vld [vmem:[#allocation7 + $0x8a0] sm:$0xff] }
 0x120   :  { %748 = vmatprep.subr.mxu0 %v634_v14  ;;  %819 = vmatprep.subr.mxu1 %v636_v15  ;;  %v707_v14 = vld [vmem:[#allocation7 + $0x8b0] sm:$0xff]  ;;  %v702_v15 = vld [vmem:[#allocation7 + $0x888] sm:$0xff] }
 0x121   :  { %749 = vmatpush1.msra.mxu0 %v633_v16  ;;  %820 = vmatpush1.msra.mxu1 %v635_v17  ;;  %v704_v16 = vld [vmem:[#allocation7 + $0x898] sm:$0xff]  ;;  %v701_v17 = vld [vmem:[#allocation7 + $0x880] sm:$0xff] }
 0x122   :  { %750 = vmatprep.subr.mxu0 %v630_v18  ;;  %821 = vmatprep.subr.mxu1 %v632_v19  ;;  %v703_v18 = vld [vmem:[#allocation7 + $0x890] sm:$0xff]  ;;  %v698_v19 = vld [vmem:[#allocation7 + $0x868] sm:$0xff] }
 0x123   :  { %751 = vmatpush1.msra.mxu0 %v629_v20  ;;  %822 = vmatpush1.msra.mxu1 %v631_v21  ;;  %v700_v20 = vld [vmem:[#allocation7 + $0x878] sm:$0xff]  ;;  %v697_v21 = vld [vmem:[#allocation7 + $0x860] sm:$0xff] }
 0x124   :  { %752 = vmatprep.subr.mxu0 %v626_v22  ;;  %823 = vmatprep.subr.mxu1 %v628_v23  ;;  %v699_v22 = vld [vmem:[#allocation7 + $0x870] sm:$0xff]  ;;  %v694_v23 = vld [vmem:[#allocation7 + $0x848] sm:$0xff] }
 0x125   :  { %753 = vmatpush1.msra.mxu0 %v625_v24  ;;  %824 = vmatpush1.msra.mxu1 %v627_v25  ;;  %v696_v24 = vld [vmem:[#allocation7 + $0x858] sm:$0xff]  ;;  %v693_v25 = vld [vmem:[#allocation7 + $0x840] sm:$0xff] }
 0x126   :  { %754 = vmatprep.subr.mxu0 %v622_v26  ;;  %825 = vmatprep.subr.mxu1 %v624_v27  ;;  %v695_v26 = vld [vmem:[#allocation7 + $0x850] sm:$0xff]  ;;  %v690_v27 = vld [vmem:[#allocation7 + $0x828] sm:$0xff] }
 0x127   :  { %755 = vmatpush1.msra.mxu0 %v621_v28  ;;  %826 = vmatpush1.msra.mxu1 %v623_v29  ;;  %v692_v28 = vld [vmem:[#allocation7 + $0x838] sm:$0xff]  ;;  %v689_v29 = vld [vmem:[#allocation7 + $0x820] sm:$0xff] }
 0x128   :  { %756 = vmatprep.subr.mxu0 %v618_v30  ;;  %827 = vmatprep.subr.mxu1 %v620_v31  ;;  %v691_v30 = vld [vmem:[#allocation7 + $0x830] sm:$0xff]  ;;  %v686_v31 = vld [vmem:[#allocation7 + $0x808] sm:$0xff] }
 0x129   :  { %757 = vmatpush1.msra.mxu0 %v617_v32  ;;  %828 = vmatpush1.msra.mxu1 %v619_v33  ;;  %v688_v32 = vld [vmem:[#allocation7 + $0x818] sm:$0xff]  ;;  %v685_v33 = vld [vmem:[#allocation7 + $0x800] sm:$0xff] }
 0x12a   :  { %758 = vmatprep.subr.mxu0 %v614_v34  ;;  %829 = vmatprep.subr.mxu1 %v616_v35  ;;  %v687_v34 = vld [vmem:[#allocation7 + $0x810] sm:$0xff]  ;;  %v682_v35 = vld [vmem:[#allocation7 + $0x7e8] sm:$0xff] }
 0x12b   :  { %759 = vmatpush1.msra.mxu0 %v613_v36  ;;  %830 = vmatpush1.msra.mxu1 %v615_v37  ;;  %v684_v36 = vld [vmem:[#allocation7 + $0x7f8] sm:$0xff]  ;;  %v681_v37 = vld [vmem:[#allocation7 + $0x7e0] sm:$0xff] }
 0x12c   :  { %760 = vmatprep.subr.mxu0 %v610_v38  ;;  %831 = vmatprep.subr.mxu1 %v612_v39  ;;  %v683_v38 = vld [vmem:[#allocation7 + $0x7f0] sm:$0xff]  ;;  %v678_v39 = vld [vmem:[#allocation7 + $0x7c8] sm:$0xff] }
 0x12d   :  { %761 = vmatpush1.msra.mxu0 %v609_v42  ;;  %832 = vmatpush1.msra.mxu1 %v611_v45  ;;  %v680_v42 = vld [vmem:[#allocation7 + $0x7d8] sm:$0xff]  ;;  %v677_v45 = vld [vmem:[#allocation7 + $0x7c0] sm:$0xff] }
 0x12e   :  { %762 = vmatprep.subr.mxu0 %v606_v46  ;;  %833 = vmatprep.subr.mxu1 %v608_v47  ;;  %v679_v46 = vld [vmem:[#allocation7 + $0x7d0] sm:$0xff]  ;;  %v674_v47 = vld [vmem:[#allocation7 + $0x7a8] sm:$0xff] }
 0x12f   :  { %763 = vmatpush1.msra.mxu0 %v605_v48  ;;  %834 = vmatpush1.msra.mxu1 %v607_v49  ;;  %v676_v48 = vld [vmem:[#allocation7 + $0x7b8] sm:$0xff]  ;;  %v673_v49 = vld [vmem:[#allocation7 + $0x7a0] sm:$0xff] }
 0x130   :  { %764 = vmatprep.subr.mxu0 %v602_v50  ;;  %835 = vmatprep.subr.mxu1 %v604_v51  ;;  %v675_v50 = vld [vmem:[#allocation7 + $0x7b0] sm:$0xff]  ;;  %v670_v51 = vld [vmem:[#allocation7 + $0x788] sm:$0xff] }
 0x131   :  { %765 = vmatpush1.msra.mxu0 %v601_v52  ;;  %836 = vmatpush1.msra.mxu1 %v603_v53  ;;  %v672_v52 = vld [vmem:[#allocation7 + $0x798] sm:$0xff]  ;;  %v669_v53 = vld [vmem:[#allocation7 + $0x780] sm:$0xff] }
 0x132   :  { %766 = vmatprep.subr.mxu0 %v598_v54  ;;  %837 = vmatprep.subr.mxu1 %v600_v55  ;;  %v671_v54 = vld [vmem:[#allocation7 + $0x790] sm:$0xff]  ;;  %v666_v55 = vld [vmem:[#allocation7 + $0x768] sm:$0xff] }
 0x133   :  { %767 = vmatpush1.msra.mxu0 %v597_v56  ;;  %838 = vmatpush1.msra.mxu1 %v599_v57  ;;  %v668_v56 = vld [vmem:[#allocation7 + $0x778] sm:$0xff]  ;;  %v665_v57 = vld [vmem:[#allocation7 + $0x760] sm:$0xff] }
 0x134   :  { %768 = vmatprep.subr.mxu0 %v594_v58  ;;  %839 = vmatprep.subr.mxu1 %v596_v59  ;;  %v667_v58 = vld [vmem:[#allocation7 + $0x770] sm:$0xff]  ;;  %v662_v59 = vld [vmem:[#allocation7 + $0x748] sm:$0xff] }
 0x135   :  { %769 = vmatpush1.msra.mxu0 %v593_v60  ;;  %840 = vmatpush1.msra.mxu1 %v595_v61  ;;  %v664_v60 = vld [vmem:[#allocation7 + $0x758] sm:$0xff]  ;;  %v661_v61 = vld [vmem:[#allocation7 + $0x740] sm:$0xff] }
 0x136   :  { %770 = vmatprep.subr.mxu0 %v590_v62  ;;  %841 = vmatprep.subr.mxu1 %v592_v63  ;;  %v663_v62 = vld [vmem:[#allocation7 + $0x750] sm:$0xff]  ;;  %v658_v63 = vld [vmem:[#allocation7 + $0x728] sm:$0xff] }
 0x137   :  { %771 = vmatpush1.msra.mxu0 %v589_v1  ;;  %842 = vmatpush1.msra.mxu1 %v591_v2  ;;  %v660_v1 = vld [vmem:[#allocation7 + $0x738] sm:$0xff]  ;;  %v657_v2 = vld [vmem:[#allocation7 + $0x720] sm:$0xff] }
 0x138   :  { %772 = vmatprep.subr.mxu0 %v714_v3  ;;  %843 = vmatprep.subr.mxu1 %v716_v4  ;;  %v659_v3 = vld [vmem:[#allocation7 + $0x730] sm:$0xff]  ;;  %v654_v4 = vld [vmem:[#allocation7 + $0x708] sm:$0xff] }
 0x139   :  { %773 = vmatpush2.msra.mxu0 %v713_v5  ;;  %844 = vmatpush2.msra.mxu1 %v715_v6  ;;  %v656_v5 = vld [vmem:[#allocation7 + $0x718] sm:$0xff]  ;;  %v653_v6 = vld [vmem:[#allocation7 + $0x700] sm:$0xff] }
 0x13a   :  { %774 = vmatprep.subr.mxu0 %v710_v7  ;;  %845 = vmatprep.subr.mxu1 %v712_v8  ;;  %v655_v7 = vld [vmem:[#allocation7 + $0x710] sm:$0xff]  ;;  %v919_v8 = vld [vmem:[#allocation9 + $0xf8] sm:$0xff] }
 0x13b   :  { %775 = vmatpush2.msra.mxu0 %v709_v9  ;;  %846 = vmatpush2.msra.mxu1 %v711_v10  ;;  %v419_v9 = vld [vmem:[#allocation7 + $0x901] ss:$8 sm:$0xf] }
 0x13c   :  { %776 = vmatprep.subr.mxu0 %v706_v11  ;;  %847 = vmatprep.subr.mxu1 %v708_v12  ;;  %v424_v10 = vrot.slane %v419_v9, %v1811_v40  ;;  %v432_v11 = vrot.slane %v419_v9, %v1813_v41  ;;  %v428_v12 = vrot.slane %v419_v9, %v1815_v43 }
 0x13d   :  { %777 = vmatpush2.msra.mxu0 %v705_v13  ;;  %848 = vmatpush2.msra.mxu1 %v707_v14  ;;  %v436_v13 = vrot.slane %v419_v9, %v1817_v44 }
 0x13e   :  { %778 = vmatprep.subr.mxu0 %v702_v15  ;;  %849 = vmatprep.subr.mxu1 %v704_v16 }
 0x13f   :  { %779 = vmatpush2.msra.mxu0 %v701_v17  ;;  %850 = vmatpush2.msra.mxu1 %v703_v18 }
 0x140   :  { %780 = vmatprep.subr.mxu0 %v698_v19  ;;  %851 = vmatprep.subr.mxu1 %v700_v20 }
 0x141   :  { %781 = vmatpush2.msra.mxu0 %v697_v21  ;;  %852 = vmatpush2.msra.mxu1 %v699_v22 }
 0x142   :  { %782 = vmatprep.subr.mxu0 %v694_v23  ;;  %853 = vmatprep.subr.mxu1 %v696_v24 }
 0x143   :  { %783 = vmatpush2.msra.mxu0 %v693_v25  ;;  %854 = vmatpush2.msra.mxu1 %v695_v26 }
 0x144   :  { %784 = vmatprep.subr.mxu0 %v690_v27  ;;  %855 = vmatprep.subr.mxu1 %v692_v28  ;;  %v903_v28 = vld [vmem:[#allocation9 + $0x78] sm:$0xff] }
 0x145   :  { %785 = vmatpush2.msra.mxu0 %v689_v29  ;;  %856 = vmatpush2.msra.mxu1 %v691_v30  ;;  %v918_v29 = vld [vmem:[#allocation9 + $0xf0] sm:$0xff] }
 0x146   :  { %786 = vmatprep.subr.mxu0 %v686_v31  ;;  %857 = vmatprep.subr.mxu1 %v688_v32  ;;  %v902_v30 = vld [vmem:[#allocation9 + $0x70] sm:$0xff]  ;;  %v917_v31 = vld [vmem:[#allocation9 + $0xe8] sm:$0xff] }
 0x147   :  { %787 = vmatpush2.msra.mxu0 %v685_v33  ;;  %858 = vmatpush2.msra.mxu1 %v687_v34  ;;  %v901_v32 = vld [vmem:[#allocation9 + $0x68] sm:$0xff]  ;;  %v916_v33 = vld [vmem:[#allocation9 + $0xe0] sm:$0xff] }
 0x148   :  { %788 = vmatprep.subr.mxu0 %v682_v35  ;;  %859 = vmatprep.subr.mxu1 %v684_v36  ;;  %v900_v34 = vld [vmem:[#allocation9 + $0x60] sm:$0xff]  ;;  %v915_v35 = vld [vmem:[#allocation9 + $0xd8] sm:$0xff] }
 0x149   :  { %789 = vmatpush2.msra.mxu0 %v681_v37  ;;  %860 = vmatpush2.msra.mxu1 %v683_v38  ;;  %v899_v36 = vld [vmem:[#allocation9 + $0x58] sm:$0xff]  ;;  %v914_v37 = vld [vmem:[#allocation9 + $0xd0] sm:$0xff] }
 0x14a   :  { %790 = vmatprep.subr.mxu0 %v678_v39  ;;  %861 = vmatprep.subr.mxu1 %v680_v42  ;;  %v898_v38 = vld [vmem:[#allocation9 + $0x50] sm:$0xff]  ;;  %v913_v39 = vld [vmem:[#allocation9 + $0xc8] sm:$0xff] }
 0x14b   :  { %791 = vmatpush2.msra.mxu0 %v677_v45  ;;  %862 = vmatpush2.msra.mxu1 %v679_v46  ;;  %v897_v42 = vld [vmem:[#allocation9 + $0x48] sm:$0xff]  ;;  %v912_v45 = vld [vmem:[#allocation9 + $0xc0] sm:$0xff] }
 0x14c   :  { %792 = vmatprep.subr.mxu0 %v674_v47  ;;  %863 = vmatprep.subr.mxu1 %v676_v48  ;;  %v896_v46 = vld [vmem:[#allocation9 + $0x40] sm:$0xff]  ;;  %v911_v47 = vld [vmem:[#allocation9 + $0xb8] sm:$0xff] }
 0x14d   :  { %793 = vmatpush2.msra.mxu0 %v673_v49  ;;  %864 = vmatpush2.msra.mxu1 %v675_v50  ;;  %v895_v48 = vld [vmem:[#allocation9 + $0x38] sm:$0xff]  ;;  %v910_v49 = vld [vmem:[#allocation9 + $0xb0] sm:$0xff] }
 0x14e   :  { %794 = vmatprep.subr.mxu0 %v670_v51  ;;  %865 = vmatprep.subr.mxu1 %v672_v52  ;;  %v894_v50 = vld [vmem:[#allocation9 + $0x30] sm:$0xff]  ;;  %v909_v51 = vld [vmem:[#allocation9 + $0xa8] sm:$0xff] }
 0x14f   :  { %795 = vmatpush2.msra.mxu0 %v669_v53  ;;  %866 = vmatpush2.msra.mxu1 %v671_v54  ;;  %v893_v52 = vld [vmem:[#allocation9 + $0x28] sm:$0xff]  ;;  %v908_v53 = vld [vmem:[#allocation9 + $0xa0] sm:$0xff] }
 0x150   :  { %796 = vmatprep.subr.mxu0 %v666_v55  ;;  %867 = vmatprep.subr.mxu1 %v668_v56  ;;  %v892_v54 = vld [vmem:[#allocation9 + $0x20] sm:$0xff]  ;;  %v907_v55 = vld [vmem:[#allocation9 + $0x98] sm:$0xff] }
 0x151   :  { %797 = vmatpush2.msra.mxu0 %v665_v57  ;;  %868 = vmatpush2.msra.mxu1 %v667_v58  ;;  %v891_v56 = vld [vmem:[#allocation9 + $0x18] sm:$0xff]  ;;  %v906_v57 = vld [vmem:[#allocation9 + $0x90] sm:$0xff] }
 0x152   :  { %798 = vmatprep.subr.mxu0 %v662_v59  ;;  %869 = vmatprep.subr.mxu1 %v664_v60  ;;  %v890_v58 = vld [vmem:[#allocation9 + $0x10] sm:$0xff]  ;;  %v905_v59 = vld [vmem:[#allocation9 + $0x88] sm:$0xff] }
 0x153   :  { %799 = vmatpush2.msra.mxu0 %v661_v61  ;;  %870 = vmatpush2.msra.mxu1 %v663_v62  ;;  %v889_v60 = vld [vmem:[#allocation9 + $0x8] sm:$0xff]  ;;  %v999_v61 = vld [vmem:[#allocation9 + $0x118] sm:$0xff]  ;;  %v904_v62 = vld [vmem:[#allocation9 + $0x80] sm:$0xff] }
 0x154   :  { %800 = vmatprep.subr.mxu0 %v658_v63  ;;  %871 = vmatprep.subr.mxu1 %v660_v1  ;;  %v888_v63 = vld [vmem:[#allocation9] sm:$0xff]  ;;  %v998_v1 = vld [vmem:[#allocation9 + $0x110] sm:$0xff] }
 0x155   :  { %801 = vmatpush2.msra.mxu0 %v657_v2  ;;  %872 = vmatpush2.msra.mxu1 %v659_v3  ;;  %v997_v2 = vld [vmem:[#allocation9 + $0x108] sm:$0xff]  ;;  %v996_v3 = vld [vmem:[#allocation9 + $0x100] sm:$0xff] }
 0x156   :  { %802 = vmatprep.subr.mxu0 %v654_v4  ;;  %873 = vmatprep.subr.mxu1 %v656_v5  ;;  %v995_v4 = vld [vmem:[#allocation6] sm:$0xff]  ;;  %v1082_v5 = vld [vmem:[#allocation9 + $0x130] sm:$0xff] }
 0x157   :  { %803 = vmatpush2.msra.mxu0 %v653_v6  ;;  %874 = vmatpush2.msra.mxu1 %v655_v7  ;;  %v718_v6 = vld [vmem:[#allocation7 + $0x902] ss:$8 sm:$0xf] }
 0x158   :  { %1582 = vmatprep.subr.mxu1 %v1762_v0  ;;  %1523 = vmatprep.subr.mxu0 %v919_v8  ;;  %v723_v7 = vrot.slane %v718_v6, %v1811_v40  ;;  %v731_v8 = vrot.slane %v718_v6, %v1813_v41  ;;  %v727_v9 = vrot.slane %v718_v6, %v1815_v43  ;;  %v1081_v41 = vld [vmem:[#allocation9 + $0x128] sm:$0xff]  ;;  %v1080_v43 = vld [vmem:[#allocation9 + $0x120] sm:$0xff] }
 0x1d8   :  { %v507_v14 = vpop.f32.mrf.mxu0  ;;  %v578_v15 = vpop.f32.mrf.mxu1 }
 0x1d9   :  { %v508_v16 = vadd.f32 %v507_v14, %v424_v10  ;;  %v579_v17 = vadd.f32 %v578_v15, %v432_v11  ;;  %v735_v10 = vrot.slane %v718_v6, %v1817_v44  ;;  %v1079_v44 = vld [vmem:[#allocation2] sm:$0xff]  ;;  %v1521_v6 = vld [vmem:[#allocation9 + $0x195] ss:$0 sm:$0xff] }
 0x1da   :  { %v509_v18 = vpop.f32.mrf.mxu0  ;;  %v580_v19 = vpop.f32.mrf.mxu1 }
 0x1db   :  { %v510_v20 = vadd.f32 %v509_v18, %v428_v12  ;;  %v581_v21 = vadd.f32 %v580_v19, %v436_v13  ;;  %v583_v22 = vmax.f32 %v508_v16, 0.0  ;;  %v585_v23 = vmax.f32 %v579_v17, 0.0 }
 0x1dd   :  { %v584_v24 = vmax.f32 %v510_v20, 0.0  ;;  %v586_v25 = vmax.f32 %v581_v21, 0.0  ;;  %v587_v27 = vmax.f32 %v583_v22, %v585_v23 }
 0x1df   :  { %v588_v26 = vmax.f32 %v584_v24, %v586_v25  ;;  %v1084_v24 = vld [vmem:[#allocation9 + $0x140] sm:$0xff]  ;;  %v1511_v25 = vld [vmem:[#allocation9 + $0x191] ss:$0 sm:$0xff] }
 0x1e1   :  { %804 = vmatprep.mubr.f32.mxu0 %v588_v26  ;;  %875 = vmatprep.mubr.f32.mxu1 %v588_v26 }
 0x1e2   :  { %805 = vmatmul.mubr.f32.vlgmr.msra.gmra.mxu0 %v587_v27  ;;  %876 = vmatmul.mubr.f32.vlgmr.msra.gmra.mxu1 %v587_v27 }
 0x1e3   :  { %1524 = vmatpush3.msra.mxu0 %v903_v28  ;;  %1583 = vmatpush3.msra.mxu1 %v999_v61  ;;  %v1083_v28 = vld [vmem:[#allocation9 + $0x138] sm:$0xff] }
 0x1e4   :  { %1525 = vmatprep.subr.mxu0 %v918_v29  ;;  %1584 = vmatprep.subr.mxu1 %v1762_v0  ;;  %v1233_v29 = vld [vmem:[#allocation9 + $0x148] sm:$0xff] }
 0x1e5   :  { %1526 = vmatpush3.msra.mxu0 %v902_v30  ;;  %1585 = vmatpush3.msra.mxu1 %v998_v1 }
 0x1e6   :  { %1527 = vmatprep.subr.mxu0 %v917_v31  ;;  %1586 = vmatprep.subr.mxu1 %v1762_v0 }
 0x1e7   :  { %1528 = vmatpush3.msra.mxu0 %v901_v32  ;;  %1587 = vmatpush3.msra.mxu1 %v997_v2  ;;  %v1510_v32 = vld [vmem:[#allocation9 + $0x190] ss:$0 sm:$0xff] }
 0x1e8   :  { %1529 = vmatprep.subr.mxu0 %v916_v33  ;;  %1590 = vmatprep.mubr.msk.f32.mxu1 %vm1763_vm1, %v1762_v0 }
 0x1e9   :  { %1530 = vmatpush3.msra.mxu0 %v900_v34  ;;  %1588 = vmatprep.subr.mxu1 %v1762_v0 }
 0x1ea   :  { %1531 = vmatprep.subr.mxu0 %v915_v35  ;;  %1589 = vmatpush3.msra.mxu1 %v996_v3  ;;  %v1519_v3 = vld [vmem:[#allocation9 + $0x194] ss:$0 sm:$0xff] }
 0x1eb   :  { %1532 = vmatpush3.msra.mxu0 %v899_v36  ;;  %1591 = vmatmul.mubr.msk.f32.vlgmr.msra.gmra.mxu1 %vm1005_vm2, %v995_v4 }
 0x1ec   :  { %1533 = vmatprep.subr.mxu0 %v914_v37  ;;  %1600 = vmatprep.subr.mxu1 %v1762_v0 }
 0x1ed   :  { %1534 = vmatpush3.msra.mxu0 %v898_v38  ;;  %1601 = vmatpush3.msra.mxu1 %v1082_v5 }
 0x1ee   :  { %1535 = vmatprep.subr.mxu0 %v913_v39  ;;  %1606 = vmatprep.mubr.msk.f32.mxu1 %vm1763_vm1, %v1762_v0 }
 0x1ef   :  { %1536 = vmatpush3.msra.mxu0 %v897_v42  ;;  %1602 = vmatprep.subr.mxu1 %v1762_v0  ;;  %v1321_v42 = vld [vmem:[#allocation9 + $0x168] sm:$0xff] }
 0x1f0   :  { %1537 = vmatprep.subr.mxu0 %v912_v45  ;;  %1603 = vmatpush3.msra.mxu1 %v1081_v41  ;;  %v1320_v45 = vld [vmem:[#allocation9 + $0x160] sm:$0xff] }
 0x1f1   :  { %1538 = vmatpush3.msra.mxu0 %v896_v46  ;;  %1604 = vmatprep.subr.mxu1 %v1762_v0  ;;  %v1319_v46 = vld [vmem:[#allocation9 + $0x158] sm:$0xff] }
 0x1f2   :  { %1539 = vmatprep.subr.mxu0 %v911_v47  ;;  %1605 = vmatpush3.msra.mxu1 %v1080_v43  ;;  %v1318_v47 = vld [vmem:[#allocation9 + $0x150] sm:$0xff] }
 0x1f3   :  { %1540 = vmatpush3.msra.mxu0 %v895_v48  ;;  %1607 = vmatmul.mubr.msk.f32.vlgmr.msra.gmra.mxu1 %vm1159_vm3, %v1079_v44 }
 0x1f4   :  { %1541 = vmatprep.subr.mxu0 %v910_v49  ;;  %1609 = vmatprep.subr.mxu1 %v1762_v0 }
 0x1f5   :  { %1542 = vmatpush3.msra.mxu0 %v894_v50  ;;  %1611 = vmatprep.mubr.msk.f32.mxu1 %vm1763_vm1, %v1762_v0  ;;  %v1516_v50 = vld [vmem:[#allocation9 + $0x192] ss:$0 sm:$0xff] }
 0x1f6   :  { %1543 = vmatprep.subr.mxu0 %v909_v51  ;;  %1610 = vmatpush3.msra.mxu1 %v1233_v29 }
 0x1f7   :  { %1544 = vmatpush3.msra.mxu0 %v893_v52  ;;  %1614 = vmatprep.subr.mxu1 %v1762_v0 }
 0x1f8   :  { %1545 = vmatprep.subr.mxu0 %v908_v53 }
 0x1f9   :  { %1546 = vmatpush3.msra.mxu0 %v892_v54 }
 0x1fa   :  { %1547 = vmatprep.subr.mxu0 %v907_v55  ;;  %v1406_v55 = vld [vmem:[#allocation9 + $0x188] sm:$0xff] }
 0x1fb   :  { %1548 = vmatpush3.msra.mxu0 %v891_v56 }
 0x1fc   :  { %1549 = vmatprep.subr.mxu0 %v906_v57  ;;  %v1405_v57 = vld [vmem:[#allocation9 + $0x180] sm:$0xff] }
 0x1fd   :  { %1550 = vmatpush3.msra.mxu0 %v890_v58  ;;  %v1404_v58 = vld [vmem:[#allocation9 + $0x178] sm:$0xff] }
 0x1fe   :  { %1551 = vmatprep.subr.mxu0 %v905_v59  ;;  %v1403_v59 = vld [vmem:[#allocation9 + $0x170] sm:$0xff] }
 0x1ff   :  { %1552 = vmatpush3.msra.mxu0 %v889_v60  ;;  %v1517_v60 = vld [vmem:[#allocation9 + $0x193] ss:$0 sm:$0xff] }
 0x200   :  { %1553 = vmatprep.subr.mxu0 %v904_v62 }
 0x201   :  { %1554 = vmatpush3.msra.mxu0 %v888_v63 }
 0x202   :  { %1593 = vmatprep.subr.mxu0 %v1762_v0 }
 0x2a2   :  { %v806_v11 = vpop.f32.mrf.mxu0  ;;  %v877_v12 = vpop.f32.mrf.mxu1 }
 0x2a3   :  { %v807_v13 = vadd.f32 %v806_v11, %v723_v7  ;;  %v878_v14 = vadd.f32 %v877_v12, %v731_v8 }
 0x2a4   :  { %v808_v15 = vpop.f32.mrf.mxu0  ;;  %v879_v16 = vpop.f32.mrf.mxu1 }
 0x2a5   :  { %v809_v17 = vadd.f32 %v808_v15, %v727_v9  ;;  %v880_v18 = vadd.f32 %v879_v16, %v735_v10  ;;  %v882_v19 = vmax.f32 %v807_v13, 0.0  ;;  %v884_v20 = vmax.f32 %v878_v14, 0.0  ;;  %v1522_v9 = vld [vmem:[#allocation9 + $0x196] ss:$0 sm:$0xff] }
 0x2a7   :  { %v883_v21 = vmax.f32 %v809_v17, 0.0  ;;  %v885_v22 = vmax.f32 %v880_v18, 0.0  ;;  %v886_v40 = vmax.f32 %v882_v19, %v884_v20 }
 0x2a9   :  { %v887_v23 = vmax.f32 %v883_v21, %v885_v22 }
 0x2ab   :  { %989 = vmatprep.mubr.f32.mxu0 %v887_v23  ;;  %v1075_v26 = vpop.f32.mrf.mxu1 }
 0x2ac   :  { %990 = vmatmul.mubr.f32.vlgmr.msra.gmra.mxu0 %v886_v40  ;;  %v1076_v27 = vadd.f32 %v1511_v25, %v1075_v26 }
 0x2ad   :  { %1597 = vmatprep.mubr.msk.f32.mxu0 %vm1763_vm1, %v1762_v0  ;;  %1594 = vmatpush3.msra.mxu0 %v1084_v24  ;;  %v1592_v30 = vpop.f32.mrf.mxu1 }
 0x2ae   :  { %1595 = vmatprep.subr.mxu0 %v1762_v0  ;;  %1612 = vmatmul.mubr.msk.f32.vlgmr.msra.gmra.mxu1 %vm1234_vm4, %v1076_v27 }
 0x2af   :  { %1596 = vmatpush3.msra.mxu0 %v1083_v28  ;;  %1622 = vmatprep.mubr.msk.f32.mxu1 %vm1763_vm1, %v1762_v0 }
 0x2b0   :  { %1615 = vmatpush3.msra.mxu1 %v1321_v42 }
 0x2b1   :  { %1616 = vmatprep.subr.mxu1 %v1762_v0 }
 0x2b2   :  { %1617 = vmatpush3.msra.mxu1 %v1320_v45 }
 0x2b3   :  { %v1229_v36 = vpop.f32.mrf.mxu1  ;;  %1618 = vmatprep.subr.mxu1 %v1762_v0 }
 0x2b4   :  { %1619 = vmatpush3.msra.mxu1 %v1319_v46 }
 0x2b5   :  { %v1608_v37 = vpop.f32.mrf.mxu1  ;;  %1620 = vmatprep.subr.mxu1 %v1762_v0 }
 0x2b6   :  { %1621 = vmatpush3.msra.mxu1 %v1318_v47 }
 0x2b7   :  { %1625 = vmatprep.subr.mxu1 %v1762_v0 }
 0x36c   :  { %v1555_v31 = vpop.f32.mrf.mxu0 }
 0x36e   :  { %v1556_v33 = vpop.f32.mrf.mxu0  ;;  %v1304_v38 = vpop.f32.mrf.mxu1 }
 0x36f   :  { %v1557_v34 = vadd.f32 %v1556_v33, %v1555_v31 }
 0x370   :  { %v1613_v39 = vpop.f32.mrf.mxu1 }
 0x371   :  { %v992_v35 = vadd.f32 %v1557_v34, %v1510_v32 }
 0x373   :  { %1598 = vmatmul.mubr.msk.f32.vlgmr.msra.gmra.mxu0 %vm1085_vm5, %v992_v35 }
 0x433   :  { %v1155_v48 = vpop.f32.mrf.mxu0 }
 0x434   :  { %v1230_v49 = vadd.f32 %v1229_v36, %v1155_v48 }
 0x435   :  { %v1599_v51 = vpop.f32.mrf.mxu0 }
 0x436   :  { %v1308_v52 = vadd.f32 %v1304_v38, %v1230_v49 }
 0x438   :  { %v1314_v53 = vadd.f32 %v1516_v50, %v1308_v52 }
 0x43a   :  { %vm1315_vm6 = vcmp.gt.f32.partialorder %v1314_v53, 0.0  ;;  %v1316_v54 = vmul.f32 0.01, %v1314_v53 }
 0x43c   :  { %v1317_v56 = vsel %vm1315_vm6, %v1314_v53, %v1316_v54 }
 0x43d   :  { %1623 = vmatmul.mubr.msk.f32.vlgmr.msra.gmra.mxu1 %vm1005_vm2, %v1317_v56 }
 0x43e   :  { %1626 = vmatpush3.msra.mxu1 %v1406_v55  ;;  %1633 = vmatprep.mubr.msk.f32.mxu1 %vm1763_vm1, %v1762_v0 }
 0x43f   :  { %1627 = vmatprep.subr.mxu1 %v1762_v0 }
 0x440   :  { %1628 = vmatpush3.msra.mxu1 %v1405_v57 }
 0x441   :  { %1629 = vmatprep.subr.mxu1 %v1762_v0 }
 0x442   :  { %1630 = vmatpush3.msra.mxu1 %v1404_v58 }
 0x443   :  { %1631 = vmatprep.subr.mxu1 %v1762_v0 }
 0x444   :  { %1632 = vmatpush3.msra.mxu1 %v1403_v59 }
 0x4fd   :  { %v1396_v61 = vpop.f32.mrf.mxu1 }
 0x4fe   :  { %v1397_v62 = vadd.f32 %v1517_v60, %v1396_v61 }
 0x4ff   :  { %v1624_v63 = vpop.f32.mrf.mxu1 }
 0x500   :  { %vm1400_vm7 = vcmp.gt.f32.partialorder %v1397_v62, 0.0  ;;  %v1401_v1 = vmul.f32 0.01, %v1397_v62 }
 0x502   :  { %v1402_v2 = vsel %vm1400_vm7, %v1397_v62, %v1401_v1 }
 0x503   :  { %1634 = vmatmul.mubr.msk.f32.vlgmr.msra.gmra.mxu1 %vm1005_vm2, %v1402_v2 }
 0x5c3   :  { %v1481_v4 = vpop.f32.mrf.mxu1 }
 0x5c4   :  { %v1482_v5 = vadd.f32 %v1519_v3, %v1481_v4 }
 0x5c5   :  { %v1635_v7 = vpop.f32.mrf.mxu1 }
 0x5c6   :  { %v1485_v8 = vmax.f32 %v1482_v5, 0.0 }
 0x5c8   :  { %v1491_v10 = vmul.f32 %v1521_v6, %v1485_v8 }
 0x5ca   :  { %v1497_v0 = vadd.f32 %v1522_v9, %v1491_v10 }
 0x5cc   :  { %v1498_v11 = vmax.f32 %v1497_v0, 0.0 }
 0x5ce   :  { %1500 = vst.msk [vmem:[%s1872_s5] sm:$0xff] %vm1499_vm8, %v1498_v11 }
 0x5cf   :  { %1505 = vsyncpa [#allocation3], 1 }
 0x5d0   :  { %1506 = vsyncpa [#allocation5], 1 }
 0x5d1   :  { %1507 = vsyncpa [#allocation8], 1 }

</bundles_post_ra>
